<compile_context>
chip_gen: v7x
topology: tpu7x:2x2x1
jax: 0.10.0
libtpu: 0.0.40
codegen_flags: <defaults>
</compile_context>

<pallas_src>
import functools
import math

import jax
import jax.numpy as jnp
import numpy as np
from jax import lax
from jax.experimental import pallas as pl
from jax.experimental.pallas import tpu as pltpu

# ---------------- small synthetic BERT config ----------------
VOCAB = 64
HIDDEN = 32
N_HEADS = 2
HEAD_DIM = HIDDEN // N_HEADS
N_LAYERS = 2
INTERMEDIATE = 64
MAX_POS = 64
PAD_TOKEN_ID = 0
SEQ_L = 8      # shared.seq_l  (tok_idx length)
WP_L = 6       # wp_idx length
BATCH = 2
LN_EPS = 1e-12
NEG_INF = -1e9


def _layer_norm(x, g, b):
    mu = jnp.mean(x, axis=-1, keepdims=True)
    var = jnp.mean(jnp.square(x - mu), axis=-1, keepdims=True)
    return (x - mu) * lax.rsqrt(var + LN_EPS) * g + b


# ---------------- the single fused encoder kernel ----------------
def _fused_encoder_kernel(
    maxc_ref,                        # SMEM scalar prefetch: (1,) int32 = seq_l + max_wp_l
    emb_ref,                         # (S_pad, H)   this batch element's summed embeddings
    emb_g_ref, emb_b_ref,            # (1, H)       embedding LayerNorm
    wqkv_ref, bqkv_ref,              # (L, H, 3H) bf16, (L, 1, 3H) f32
    wo_ref, bo_ref,                  # (L, H, H) bf16,  (L, 1, H)  f32
    ln1_g_ref, ln1_b_ref,            # (L, 1, H)
    wi_ref, bi_ref,                  # (L, H, I) bf16,  (L, 1, I)
    wo2_ref, bo2_ref,                # (L, I, H) bf16,  (L, 1, H)
    ln2_g_ref, ln2_b_ref,            # (L, 1, H)
    out_ref,                         # (S_pad, H)
    *, s_pad,
):
    maxc = maxc_ref[0]
    scale = 1.0 / math.sqrt(HEAD_DIM)

    # Key mask (data-dependent truncation emulation), built ONCE and reused by every head
    # of every layer.  Padded/truncated key positions never contribute to any query row.
    col = lax.broadcasted_iota(jnp.int32, (s_pad, s_pad), 1)
    key_mask = jnp.where(col < maxc, 0.0, NEG_INF)                   # (S_pad, S_pad) f32

    # ---- embedding LayerNorm ----
    h = _layer_norm(emb_ref[...], emb_g_ref[...], emb_b_ref[...])    # (S_pad, H) f32

    # ---- transformer layers, fully unrolled inside one kernel invocation ----
    for l in range(N_LAYERS):
        # fused QKV projection (bf16 MXU inputs, f32 accumulation)
        qkv = jnp.dot(h.astype(jnp.bfloat16), wqkv_ref[l],
                      preferred_element_type=jnp.float32) + bqkv_ref[l]   # (S_pad, 3H)

        # attention: all heads in one batched einsum over N_HEADS
        qs, ks, vs = [], [], []
        for hd in range(N_HEADS):
            c0 = hd * HEAD_DIM
            qs.append(qkv[:, c0:c0 + HEAD_DIM])
            ks.append(qkv[:, HIDDEN + c0:HIDDEN + c0 + HEAD_DIM])
            vs.append(qkv[:, 2 * HIDDEN + c0:2 * HIDDEN + c0 + HEAD_DIM])
        q3 = jnp.stack(qs, axis=0).astype(jnp.bfloat16)               # (NH, S_pad, HD)
        k3 = jnp.stack(ks, axis=0).astype(jnp.bfloat16)
        v3 = jnp.stack(vs, axis=0).astype(jnp.bfloat16)

        s = jnp.einsum('hqd,hkd->hqk', q3, k3,
                       preferred_element_type=jnp.float32) * scale
        s = s + key_mask[None]
        s = s - jnp.max(s, axis=-1, keepdims=True)
        p = jnp.exp(s)
        p = p * pl.reciprocal(jnp.sum(p, axis=-1, keepdims=True), approx=True)
        ctx3 = jnp.einsum('hqk,hkd->hqd', p.astype(jnp.bfloat16), v3,
                          preferred_element_type=jnp.float32)          # (NH, S_pad, HD)
        ctx = jnp.concatenate([ctx3[hd] for hd in range(N_HEADS)], axis=-1)  # (S_pad, H)

        # attention output projection + residual + LayerNorm (fused)
        attn = jnp.dot(ctx.astype(jnp.bfloat16), wo_ref[l],
                       preferred_element_type=jnp.float32) + bo_ref[l]
        h1 = _layer_norm(attn + h, ln1_g_ref[l], ln1_b_ref[l])

        # FFN (bias + GELU fused) + residual + LayerNorm (fused)
        inter = jax.nn.gelu(
            jnp.dot(h1.astype(jnp.bfloat16), wi_ref[l],
                    preferred_element_type=jnp.float32) + bi_ref[l],
            approximate=True)
        ffn = jnp.dot(inter.astype(jnp.bfloat16), wo2_ref[l],
                      preferred_element_type=jnp.float32) + bo2_ref[l]
        h = _layer_norm(ffn + h1, ln2_g_ref[l], ln2_b_ref[l])

    # Pooler path deleted: `last + pooled * 0.0 == last` for finite pooled values.
    out_ref[...] = h                                                  # single full-block store


# ---------------- parameter packing (done once, outside jit) ----------------
def pack_params(params):
    L = len(params["layers"])

    def stk(name):
        return jnp.stack([lp[name] for lp in params["layers"]], axis=0)

    return {
        "word_emb": params["word_emb"],
        "pos_emb": params["pos_emb"],
        "type_emb": params["type_emb"],
        "emb_ln_g": params["emb_ln_g"].reshape(1, HIDDEN),
        "emb_ln_b": params["emb_ln_b"].reshape(1, HIDDEN),
        # matmul weights in bf16 (MXU-native on v5e/v6e/v7x); biases / LN params stay f32
        "wqkv": jnp.stack(
            [jnp.concatenate([lp["wq"], lp["wk"], lp["wv"]], axis=1)
             for lp in params["layers"]], axis=0).astype(jnp.bfloat16),     # (L, H, 3H)
        "bqkv": jnp.stack(
            [jnp.concatenate([lp["bq"], lp["bk"], lp["bv"]])
             for lp in params["layers"]], axis=0).reshape(L, 1, 3 * HIDDEN),
        "wo": stk("wo").astype(jnp.bfloat16),
        "bo": stk("bo").reshape(L, 1, HIDDEN),
        "ln1_g": stk("ln1_g").reshape(L, 1, HIDDEN),
        "ln1_b": stk("ln1_b").reshape(L, 1, HIDDEN),
        "wi": stk("wi").astype(jnp.bfloat16),
        "bi": stk("bi").reshape(L, 1, INTERMEDIATE),
        "wo2": stk("wo2").astype(jnp.bfloat16),
        "bo2": stk("bo2").reshape(L, 1, HIDDEN),
        "ln2_g": stk("ln2_g").reshape(L, 1, HIDDEN),
        "ln2_b": stk("ln2_b").reshape(L, 1, HIDDEN),
    }


# ---------------- forward: one pallas_call ----------------
def wp_encoder_forward(packed, tok_idx, wp_idx):
    B, seq_l = tok_idx.shape
    assert seq_l == SEQ_L                       # mirrors `assert shared.seq_l == ...`
    max_wp_l = jnp.max(jnp.sum((wp_idx != PAD_TOKEN_ID).astype(jnp.int32), axis=-1))
    max_concat_l = jnp.asarray(seq_l + max_wp_l, dtype=jnp.int32).reshape(1)

    concat = jnp.concatenate([tok_idx, wp_idx], axis=1)              # (B, stot)
    stot = concat.shape[1]
    # pad token axis to a sublane multiple (14 -> 16); extra keys are masked in-kernel
    s_pad = ((stot + 7) // 8) * 8
    concat = jnp.pad(concat, ((0, 0), (0, s_pad - stot)), constant_values=PAD_TOKEN_ID)

    # embedding gathers are plain-JAX glue; everything downstream runs in the kernel
    emb = (packed["word_emb"][concat]
           + packed["pos_emb"][:s_pad][None]
           + packed["type_emb"][0][None, None]).reshape(B * s_pad, HIDDEN)

    kernel = functools.partial(_fused_encoder_kernel, s_pad=s_pad)
    L = packed["wqkv"].shape[0]

    grid_spec = pltpu.PrefetchScalarGridSpec(
        num_scalar_prefetch=1,
        grid=(B,),                              # batch axis -> 2 TensorCores on v7x
        in_specs=[
            pl.BlockSpec((s_pad, HIDDEN), lambda b, mc: (b, 0)),               # emb
            pl.BlockSpec((1, HIDDEN), lambda b, mc: (0, 0)),                   # emb_ln_g
            pl.BlockSpec((1, HIDDEN), lambda b, mc: (0, 0)),                   # emb_ln_b
            pl.BlockSpec((L, HIDDEN, 3 * HIDDEN), lambda b, mc: (0, 0, 0)),    # wqkv
            pl.BlockSpec((L, 1, 3 * HIDDEN), lambda b, mc: (0, 0, 0)),         # bqkv
            pl.BlockSpec((L, HIDDEN, HIDDEN), lambda b, mc: (0, 0, 0)),        # wo
            pl.BlockSpec((L, 1, HIDDEN), lambda b, mc: (0, 0, 0)),             # bo
            pl.BlockSpec((L, 1, HIDDEN), lambda b, mc: (0, 0, 0)),             # ln1_g
            pl.BlockSpec((L, 1, HIDDEN), lambda b, mc: (0, 0, 0)),             # ln1_b
            pl.BlockSpec((L, HIDDEN, INTERMEDIATE), lambda b, mc: (0, 0, 0)),  # wi
            pl.BlockSpec((L, 1, INTERMEDIATE), lambda b, mc: (0, 0, 0)),       # bi
            pl.BlockSpec((L, INTERMEDIATE, HIDDEN), lambda b, mc: (0, 0, 0)),  # wo2
            pl.BlockSpec((L, 1, HIDDEN), lambda b, mc: (0, 0, 0)),             # bo2
            pl.BlockSpec((L, 1, HIDDEN), lambda b, mc: (0, 0, 0)),             # ln2_g
            pl.BlockSpec((L, 1, HIDDEN), lambda b, mc: (0, 0, 0)),             # ln2_b
        ],
        out_specs=pl.BlockSpec((s_pad, HIDDEN), lambda b, mc: (b, 0)),
    )

    out2d = pl.pallas_call(
        kernel,
        out_shape=jax.ShapeDtypeStruct((B * s_pad, HIDDEN), jnp.float32),
        grid_spec=grid_spec,
        compiler_params=pltpu.CompilerParams(
            dimension_semantics=("parallel",)),
    )(max_concat_l, emb,
      packed["emb_ln_g"], packed["emb_ln_b"],
      packed["wqkv"], packed["bqkv"], packed["wo"], packed["bo"],
      packed["ln1_g"], packed["ln1_b"], packed["wi"], packed["bi"],
      packed["wo2"], packed["bo2"], packed["ln2_g"], packed["ln2_b"])

    return out2d.reshape(B, s_pad, HIDDEN)[:, :seq_l, :]


# ---------------- pure-JAX reference (same math, f32) ----------------
def ref_forward(params, tok_idx, wp_idx):
    B, seq_l = tok_idx.shape
    max_wp_l = jnp.max(jnp.sum((wp_idx != PAD_TOKEN_ID).astype(jnp.int32), axis=-1))
    max_concat_l = seq_l + max_wp_l
    concat = jnp.concatenate([tok_idx, wp_idx], axis=1)
    Stot = concat.shape[1]
    key_mask = jnp.where(jnp.arange(Stot)[None, :] < max_concat_l, 0.0, NEG_INF)

    def ln(x, g, b):
        mu = jnp.mean(x, -1, keepdims=True)
        var = jnp.mean((x - mu) ** 2, -1, keepdims=True)
        return (x - mu) * jax.lax.rsqrt(var + LN_EPS) * g + b

    h = (params["word_emb"][concat]
         + params["pos_emb"][jnp.arange(Stot)][None]
         + params["type_emb"][0][None, None])
    h = ln(h, params["emb_ln_g"], params["emb_ln_b"])
    for lp in params["layers"]:
        def proj(x, w, b):
            return x @ w + b
        q = proj(h, lp["wq"], lp["bq"]).reshape(B, Stot, N_HEADS, HEAD_DIM).transpose(0, 2, 1, 3)
        k = proj(h, lp["wk"], lp["bk"]).reshape(B, Stot, N_HEADS, HEAD_DIM).transpose(0, 2, 1, 3)
        v = proj(h, lp["wv"], lp["bv"]).reshape(B, Stot, N_HEADS, HEAD_DIM).transpose(0, 2, 1, 3)
        s = jnp.einsum("bhqd,bhkd->bhqk", q, k) / math.sqrt(HEAD_DIM)
        s = s + key_mask[None, None]
        p = jax.nn.softmax(s, axis=-1)
        ctx = jnp.einsum("bhqk,bhkd->bhqd", p, v).transpose(0, 2, 1, 3).reshape(B, Stot, HIDDEN)
        a = proj(ctx, lp["wo"], lp["bo"])
        h = ln(a + h, lp["ln1_g"], lp["ln1_b"])
        i = jax.nn.gelu(proj(h, lp["wi"], lp["bi"]), approximate=True)
        o = proj(i, lp["wo2"], lp["bo2"])
        h = ln(o + h, lp["ln2_g"], lp["ln2_b"])
    pooled = jnp.tanh(h[:, 0] @ params["pool_w"] + params["pool_b"])
    last = h + pooled[:, None, :] * 0.0
    return last[:, :seq_l]


# ---------------- deterministic parameter init ----------------
def init_params(key):
    def dense(k, fan_in, fan_out):
        k1, k2 = jax.random.split(k)
        return (0.02 * jax.random.normal(k1, (fan_in, fan_out), jnp.float32),
                0.02 * jax.random.normal(k2, (fan_out,), jnp.float32))

    keys = jax.random.split(key, 4 + N_LAYERS)
    params = {
        "word_emb": 0.02 * jax.random.normal(keys[0], (VOCAB, HIDDEN), jnp.float32),
        "pos_emb": 0.02 * jax.random.normal(keys[1], (MAX_POS, HIDDEN), jnp.float32),
        "type_emb": 0.02 * jax.random.normal(keys[2], (2, HIDDEN), jnp.float32),
        "emb_ln_g": jnp.ones((HIDDEN,), jnp.float32),
        "emb_ln_b": jnp.zeros((HIDDEN,), jnp.float32),
        "layers": [],
    }
    for l in range(N_LAYERS):
        lk = jax.random.split(keys[4 + l], 6)
        wq, bq = dense(lk[0], HIDDEN, HIDDEN)
        wk, bk = dense(lk[1], HIDDEN, HIDDEN)
        wv, bv = dense(lk[2], HIDDEN, HIDDEN)
        wo, bo = dense(lk[3], HIDDEN, HIDDEN)
        wi, bi = dense(lk[4], HIDDEN, INTERMEDIATE)
        wo2, bo2 = dense(lk[5], INTERMEDIATE, HIDDEN)
        params["layers"].append({
            "wq": wq, "bq": bq, "wk": wk, "bk": bk, "wv": wv, "bv": bv,
            "wo": wo, "bo": bo,
            "ln1_g": jnp.ones((HIDDEN,), jnp.float32),
            "ln1_b": jnp.zeros((HIDDEN,), jnp.float32),
            "wi": wi, "bi": bi, "wo2": wo2, "bo2": bo2,
            "ln2_g": jnp.ones((HIDDEN,), jnp.float32),
            "ln2_b": jnp.zeros((HIDDEN,), jnp.float32),
        })
    pw, pb = dense(keys[3], HIDDEN, HIDDEN)
    params["pool_w"] = pw     # kept for the f32 reference; unused by the kernel (dead path)
    params["pool_b"] = pb
    return params


if __name__ == "__main__":
    key = jax.random.PRNGKey(0)
    pkey, tkey = jax.random.split(key)
    params = init_params(pkey)
    packed = pack_params(params)

    tok_idx = jax.random.randint(tkey, (BATCH, SEQ_L), 1, VOCAB, dtype=jnp.int32)
    # word-piece ids with trailing pads so max_wp_l < WP_L (exercises truncation)
    wp_idx = jnp.array([[5, 9, 12, PAD_TOKEN_ID, PAD_TOKEN_ID, PAD_TOKEN_ID],
                        [7, 3, PAD_TOKEN_ID, PAD_TOKEN_ID, PAD_TOKEN_ID, PAD_TOKEN_ID]],
                       dtype=jnp.int32)

    fwd = jax.jit(wp_encoder_forward)
    out = fwd(packed, tok_idx, wp_idx)
    out = jax.block_until_ready(out)

    ref = jax.block_until_ready(ref_forward(params, tok_idx, wp_idx))

    assert out.shape == (BATCH, SEQ_L, HIDDEN), out.shape
    assert bool(jnp.all(jnp.isfinite(out)))
    # kernel uses bf16 MXU inputs (f32 accumulation) + approx softmax reciprocal vs f32 ref
    np.testing.assert_allclose(np.asarray(out), np.asarray(ref), rtol=2e-2, atol=2e-2)

    print("KERNEL_OK")
</pallas_src>

<mosaic_0001>
module attributes {stable_mosaic.version = 11 : i64} {
  func.func @_fused_encoder_kernel(%arg0: i32, %arg1: memref<1xi32, #tpu.memory_space<smem>>, %arg2: memref<16x32xf32, #tpu.memory_space<vmem>>, %arg3: memref<1x32xf32, #tpu.memory_space<vmem>>, %arg4: memref<1x32xf32, #tpu.memory_space<vmem>>, %arg5: memref<2x32x96xbf16, #tpu.memory_space<vmem>>, %arg6: memref<2x1x96xf32, #tpu.memory_space<vmem>>, %arg7: memref<2x32x32xbf16, #tpu.memory_space<vmem>>, %arg8: memref<2x1x32xf32, #tpu.memory_space<vmem>>, %arg9: memref<2x1x32xf32, #tpu.memory_space<vmem>>, %arg10: memref<2x1x32xf32, #tpu.memory_space<vmem>>, %arg11: memref<2x32x64xbf16, #tpu.memory_space<vmem>>, %arg12: memref<2x1x64xf32, #tpu.memory_space<vmem>>, %arg13: memref<2x64x32xbf16, #tpu.memory_space<vmem>>, %arg14: memref<2x1x32xf32, #tpu.memory_space<vmem>>, %arg15: memref<2x1x32xf32, #tpu.memory_space<vmem>>, %arg16: memref<2x1x32xf32, #tpu.memory_space<vmem>>, %arg17: memref<16x32xf32, #tpu.memory_space<vmem>>) attributes {dimension_semantics = [#tpu.dimension_semantics<parallel>], iteration_bounds = array<i64: 2>, scalar_prefetch = 1 : i64, scratch_operands = 0 : i64, tpu.core_type = #tpu.core_type<tc>, window_params = [{transform_indices = @transform_0, window_bounds = array<i64: 16, 32>}, {pipeline_mode = #tpu.pipeline_mode<synchronous>, transform_indices = @transform_1, window_bounds = array<i64: 1, 32>}, {pipeline_mode = #tpu.pipeline_mode<synchronous>, transform_indices = @transform_2, window_bounds = array<i64: 1, 32>}, {pipeline_mode = #tpu.pipeline_mode<synchronous>, transform_indices = @transform_3, window_bounds = array<i64: 2, 32, 96>}, {pipeline_mode = #tpu.pipeline_mode<synchronous>, transform_indices = @transform_4, window_bounds = array<i64: 2, 1, 96>}, {pipeline_mode = #tpu.pipeline_mode<synchronous>, transform_indices = @transform_5, window_bounds = array<i64: 2, 32, 32>}, {pipeline_mode = #tpu.pipeline_mode<synchronous>, transform_indices = @transform_6, window_bounds = array<i64: 2, 1, 32>}, {pipeline_mode = #tpu.pipeline_mode<synchronous>, transform_indices = @transform_7, window_bounds = array<i64: 2, 1, 32>}, {pipeline_mode = #tpu.pipeline_mode<synchronous>, transform_indices = @transform_8, window_bounds = array<i64: 2, 1, 32>}, {pipeline_mode = #tpu.pipeline_mode<synchronous>, transform_indices = @transform_9, window_bounds = array<i64: 2, 32, 64>}, {pipeline_mode = #tpu.pipeline_mode<synchronous>, transform_indices = @transform_10, window_bounds = array<i64: 2, 1, 64>}, {pipeline_mode = #tpu.pipeline_mode<synchronous>, transform_indices = @transform_11, window_bounds = array<i64: 2, 64, 32>}, {pipeline_mode = #tpu.pipeline_mode<synchronous>, transform_indices = @transform_12, window_bounds = array<i64: 2, 1, 32>}, {pipeline_mode = #tpu.pipeline_mode<synchronous>, transform_indices = @transform_13, window_bounds = array<i64: 2, 1, 32>}, {pipeline_mode = #tpu.pipeline_mode<synchronous>, transform_indices = @transform_14, window_bounds = array<i64: 2, 1, 32>}, {transform_indices = @transform_15, window_bounds = array<i64: 16, 32>}]} {
    %c0 = arith.constant 0 : index
    %0 = memref.load %arg1[%c0] : memref<1xi32, #tpu.memory_space<smem>>
    %1 = tpu.iota {dimensions = array<i32: 1>} : vector<16x16xi32>
    %2 = vector.broadcast %0 : i32 to vector<16x16xi32>
    %3 = arith.cmpi slt, %1, %2 : vector<16x16xi32>
    %cst = arith.constant 0.000000e+00 : f32
    %cst_0 = arith.constant -1.000000e+09 : f32
    %4 = vector.broadcast %cst : f32 to vector<16x16xf32>
    %5 = vector.broadcast %cst_0 : f32 to vector<16x16xf32>
    %6 = arith.select %3, %4, %5 : vector<16x16xi1>, vector<16x16xf32>
    %c0_1 = arith.constant 0 : index
    %c0_2 = arith.constant 0 : index
    %7 = vector.load %arg2[%c0_1, %c0_2] : memref<16x32xf32, #tpu.memory_space<vmem>>, vector<16x32xf32>
    %c0_3 = arith.constant 0 : index
    %c0_4 = arith.constant 0 : index
    %8 = vector.load %arg3[%c0_3, %c0_4] : memref<1x32xf32, #tpu.memory_space<vmem>>, vector<1x32xf32>
    %c0_5 = arith.constant 0 : index
    %c0_6 = arith.constant 0 : index
    %9 = vector.load %arg4[%c0_5, %c0_6] : memref<1x32xf32, #tpu.memory_space<vmem>>, vector<1x32xf32>
    %cst_7 = arith.constant dense<0.000000e+00> : vector<16xf32>
    %10 = vector.multi_reduction <add>, %7, %cst_7 [1] : vector<16x32xf32> to vector<16xf32>
    %11 = vector.shape_cast %10 : vector<16xf32> to vector<16x1xf32>
    %cst_8 = arith.constant 3.200000e+01 : f32
    %12 = vector.broadcast %cst_8 : f32 to vector<16x1xf32>
    %13 = arith.divf %11, %12 : vector<16x1xf32>
    %14 = vector.broadcast %13 : vector<16x1xf32> to vector<16x32xf32>
    %15 = arith.subf %7, %14 : vector<16x32xf32>
    %16 = arith.mulf %15, %15 : vector<16x32xf32>
    %cst_9 = arith.constant dense<0.000000e+00> : vector<16xf32>
    %17 = vector.multi_reduction <add>, %16, %cst_9 [1] : vector<16x32xf32> to vector<16xf32>
    %18 = vector.shape_cast %17 : vector<16xf32> to vector<16x1xf32>
    %cst_10 = arith.constant 3.200000e+01 : f32
    %19 = vector.broadcast %cst_10 : f32 to vector<16x1xf32>
    %20 = arith.divf %18, %19 : vector<16x1xf32>
    %21 = vector.broadcast %13 : vector<16x1xf32> to vector<16x32xf32>
    %22 = arith.subf %7, %21 : vector<16x32xf32>
    %cst_11 = arith.constant 9.99999996E-13 : f32
    %23 = vector.broadcast %cst_11 : f32 to vector<16x1xf32>
    %24 = arith.addf %20, %23 : vector<16x1xf32>
    %25 = math.rsqrt %24 : vector<16x1xf32>
    %26 = vector.broadcast %25 : vector<16x1xf32> to vector<16x32xf32>
    %27 = arith.mulf %22, %26 : vector<16x32xf32>
    %28 = vector.broadcast %8 : vector<1x32xf32> to vector<16x32xf32>
    %29 = arith.mulf %27, %28 : vector<16x32xf32>
    %30 = vector.broadcast %9 : vector<1x32xf32> to vector<16x32xf32>
    %31 = arith.addf %29, %30 : vector<16x32xf32>
    %32 = arith.truncf %31 : vector<16x32xf32> to vector<16x32xbf16>
    %c0_12 = arith.constant 0 : index
    %c0_13 = arith.constant 0 : index
    %c0_14 = arith.constant 0 : index
    %33 = vector.load %arg5[%c0_12, %c0_13, %c0_14] : memref<2x32x96xbf16, #tpu.memory_space<vmem>>, vector<1x32x96xbf16>
    %34 = vector.shape_cast %33 : vector<1x32x96xbf16> to vector<32x96xbf16>
    %cst_15 = arith.constant dense<0.000000e+00> : vector<16x96xf32>
    %35 = tpu.matmul %32, %34, %cst_15 {dimension_numbers = #tpu.dot_dimension_numbers<[1], [0], [0], [1], [0, 0, 1, 1], [], []>} : vector<16x32xbf16>, vector<32x96xbf16>, vector<16x96xf32> -> vector<16x96xf32>
    %c0_16 = arith.constant 0 : index
    %c0_17 = arith.constant 0 : index
    %c0_18 = arith.constant 0 : index
    %36 = vector.load %arg6[%c0_16, %c0_17, %c0_18] : memref<2x1x96xf32, #tpu.memory_space<vmem>>, vector<1x1x96xf32>
    %37 = vector.shape_cast %36 : vector<1x1x96xf32> to vector<1x96xf32>
    %38 = vector.broadcast %37 : vector<1x96xf32> to vector<16x96xf32>
    %39 = arith.addf %35, %38 : vector<16x96xf32>
    %40 = vector.extract_strided_slice %39 {offsets = [0, 0], sizes = [16, 16], strides = [1, 1]} : vector<16x96xf32> to vector<16x16xf32>
    %41 = vector.extract_strided_slice %39 {offsets = [0, 32], sizes = [16, 16], strides = [1, 1]} : vector<16x96xf32> to vector<16x16xf32>
    %42 = vector.extract_strided_slice %39 {offsets = [0, 64], sizes = [16, 16], strides = [1, 1]} : vector<16x96xf32> to vector<16x16xf32>
    %43 = vector.extract_strided_slice %39 {offsets = [0, 16], sizes = [16, 16], strides = [1, 1]} : vector<16x96xf32> to vector<16x16xf32>
    %44 = vector.extract_strided_slice %39 {offsets = [0, 48], sizes = [16, 16], strides = [1, 1]} : vector<16x96xf32> to vector<16x16xf32>
    %45 = vector.extract_strided_slice %39 {offsets = [0, 80], sizes = [16, 16], strides = [1, 1]} : vector<16x96xf32> to vector<16x16xf32>
    %46 = vector.shape_cast %40 : vector<16x16xf32> to vector<1x16x16xf32>
    %47 = vector.shape_cast %43 : vector<16x16xf32> to vector<1x16x16xf32>
    %48 = tpu.concatenate %46, %47 in 0 : vector<1x16x16xf32>, vector<1x16x16xf32> -> vector<2x16x16xf32>
    %49 = arith.truncf %48 : vector<2x16x16xf32> to vector<2x16x16xbf16>
    %50 = vector.shape_cast %41 : vector<16x16xf32> to vector<1x16x16xf32>
    %51 = vector.shape_cast %44 : vector<16x16xf32> to vector<1x16x16xf32>
    %52 = tpu.concatenate %50, %51 in 0 : vector<1x16x16xf32>, vector<1x16x16xf32> -> vector<2x16x16xf32>
    %53 = arith.truncf %52 : vector<2x16x16xf32> to vector<2x16x16xbf16>
    %54 = vector.shape_cast %42 : vector<16x16xf32> to vector<1x16x16xf32>
    %55 = vector.shape_cast %45 : vector<16x16xf32> to vector<1x16x16xf32>
    %56 = tpu.concatenate %54, %55 in 0 : vector<1x16x16xf32>, vector<1x16x16xf32> -> vector<2x16x16xf32>
    %57 = arith.truncf %56 : vector<2x16x16xf32> to vector<2x16x16xbf16>
    "tpu.trace_start"() <{level = 10 : i32, message = "hqd,hkd->hqk"}> : () -> ()
    %cst_19 = arith.constant dense<0.000000e+00> : vector<2x16x16xf32>
    %58 = tpu.matmul %49, %53, %cst_19 {dimension_numbers = #tpu.dot_dimension_numbers<[2], [2], [1], [1], [0, 0, 0, 1, 1, 1], [0], [0]>} : vector<2x16x16xbf16>, vector<2x16x16xbf16>, vector<2x16x16xf32> -> vector<2x16x16xf32>
    "tpu.trace_stop"() : () -> ()
    %cst_20 = arith.constant 2.500000e-01 : f32
    %59 = vector.broadcast %cst_20 : f32 to vector<2x16x16xf32>
    %60 = arith.mulf %58, %59 : vector<2x16x16xf32>
    %61 = vector.shape_cast %6 : vector<16x16xf32> to vector<1x16x16xf32>
    %62 = vector.broadcast %61 : vector<1x16x16xf32> to vector<2x16x16xf32>
    %63 = arith.addf %60, %62 : vector<2x16x16xf32>
    %cst_21 = arith.constant dense<0xFF800000> : vector<2x16xf32>
    %64 = vector.multi_reduction <maximumf>, %63, %cst_21 [2] : vector<2x16x16xf32> to vector<2x16xf32>
    %65 = vector.shape_cast %64 : vector<2x16xf32> to vector<2x16x1xf32>
    %66 = vector.broadcast %65 : vector<2x16x1xf32> to vector<2x16x16xf32>
    %67 = arith.subf %63, %66 : vector<2x16x16xf32>
    %68 = math.exp %67 : vector<2x16x16xf32>
    %cst_22 = arith.constant dense<0.000000e+00> : vector<2x16xf32>
    %69 = vector.multi_reduction <add>, %68, %cst_22 [2] : vector<2x16x16xf32> to vector<2x16xf32>
    %70 = vector.shape_cast %69 : vector<2x16xf32> to vector<2x16x1xf32>
    %71 = tpu.reciprocal %70 {approx = true} : vector<2x16x1xf32> -> vector<2x16x1xf32>
    %72 = vector.broadcast %71 : vector<2x16x1xf32> to vector<2x16x16xf32>
    %73 = arith.mulf %68, %72 : vector<2x16x16xf32>
    %74 = arith.truncf %73 : vector<2x16x16xf32> to vector<2x16x16xbf16>
    "tpu.trace_start"() <{level = 10 : i32, message = "hqk,hkd->hqd"}> : () -> ()
    %cst_23 = arith.constant dense<0.000000e+00> : vector<2x16x16xf32>
    %75 = tpu.matmul %74, %57, %cst_23 {dimension_numbers = #tpu.dot_dimension_numbers<[2], [1], [1], [2], [0, 0, 0, 1, 1, 2], [0], [0]>} : vector<2x16x16xbf16>, vector<2x16x16xbf16>, vector<2x16x16xf32> -> vector<2x16x16xf32>
    "tpu.trace_stop"() : () -> ()
    %76 = vector.extract_strided_slice %75 {offsets = [0, 0, 0], sizes = [1, 16, 16], strides = [1, 1, 1]} : vector<2x16x16xf32> to vector<1x16x16xf32>
    %77 = vector.shape_cast %76 : vector<1x16x16xf32> to vector<16x16xf32>
    %78 = vector.extract_strided_slice %75 {offsets = [1, 0, 0], sizes = [1, 16, 16], strides = [1, 1, 1]} : vector<2x16x16xf32> to vector<1x16x16xf32>
    %79 = vector.shape_cast %78 : vector<1x16x16xf32> to vector<16x16xf32>
    %80 = tpu.concatenate %77, %79 in 1 : vector<16x16xf32>, vector<16x16xf32> -> vector<16x32xf32>
    %81 = arith.truncf %80 : vector<16x32xf32> to vector<16x32xbf16>
    %c0_24 = arith.constant 0 : index
    %c0_25 = arith.constant 0 : index
    %c0_26 = arith.constant 0 : index
    %82 = vector.load %arg7[%c0_24, %c0_25, %c0_26] : memref<2x32x32xbf16, #tpu.memory_space<vmem>>, vector<1x32x32xbf16>
    %83 = vector.shape_cast %82 : vector<1x32x32xbf16> to vector<32x32xbf16>
    %cst_27 = arith.constant dense<0.000000e+00> : vector<16x32xf32>
    %84 = tpu.matmul %81, %83, %cst_27 {dimension_numbers = #tpu.dot_dimension_numbers<[1], [0], [0], [1], [0, 0, 1, 1], [], []>} : vector<16x32xbf16>, vector<32x32xbf16>, vector<16x32xf32> -> vector<16x32xf32>
    %c0_28 = arith.constant 0 : index
    %c0_29 = arith.constant 0 : index
    %c0_30 = arith.constant 0 : index
    %85 = vector.load %arg8[%c0_28, %c0_29, %c0_30] : memref<2x1x32xf32, #tpu.memory_space<vmem>>, vector<1x1x32xf32>
    %86 = vector.shape_cast %85 : vector<1x1x32xf32> to vector<1x32xf32>
    %87 = vector.broadcast %86 : vector<1x32xf32> to vector<16x32xf32>
    %88 = arith.addf %84, %87 : vector<16x32xf32>
    %89 = arith.addf %88, %31 : vector<16x32xf32>
    %c0_31 = arith.constant 0 : index
    %c0_32 = arith.constant 0 : index
    %c0_33 = arith.constant 0 : index
    %90 = vector.load %arg9[%c0_31, %c0_32, %c0_33] : memref<2x1x32xf32, #tpu.memory_space<vmem>>, vector<1x1x32xf32>
    %91 = vector.shape_cast %90 : vector<1x1x32xf32> to vector<1x32xf32>
    %c0_34 = arith.constant 0 : index
    %c0_35 = arith.constant 0 : index
    %c0_36 = arith.constant 0 : index
    %92 = vector.load %arg10[%c0_34, %c0_35, %c0_36] : memref<2x1x32xf32, #tpu.memory_space<vmem>>, vector<1x1x32xf32>
    %93 = vector.shape_cast %92 : vector<1x1x32xf32> to vector<1x32xf32>
    %cst_37 = arith.constant dense<0.000000e+00> : vector<16xf32>
    %94 = vector.multi_reduction <add>, %89, %cst_37 [1] : vector<16x32xf32> to vector<16xf32>
    %95 = vector.shape_cast %94 : vector<16xf32> to vector<16x1xf32>
    %cst_38 = arith.constant 3.200000e+01 : f32
    %96 = vector.broadcast %cst_38 : f32 to vector<16x1xf32>
    %97 = arith.divf %95, %96 : vector<16x1xf32>
    %98 = vector.broadcast %97 : vector<16x1xf32> to vector<16x32xf32>
    %99 = arith.subf %89, %98 : vector<16x32xf32>
    %100 = arith.mulf %99, %99 : vector<16x32xf32>
    %cst_39 = arith.constant dense<0.000000e+00> : vector<16xf32>
    %101 = vector.multi_reduction <add>, %100, %cst_39 [1] : vector<16x32xf32> to vector<16xf32>
    %102 = vector.shape_cast %101 : vector<16xf32> to vector<16x1xf32>
    %cst_40 = arith.constant 3.200000e+01 : f32
    %103 = vector.broadcast %cst_40 : f32 to vector<16x1xf32>
    %104 = arith.divf %102, %103 : vector<16x1xf32>
    %105 = vector.broadcast %97 : vector<16x1xf32> to vector<16x32xf32>
    %106 = arith.subf %89, %105 : vector<16x32xf32>
    %cst_41 = arith.constant 9.99999996E-13 : f32
    %107 = vector.broadcast %cst_41 : f32 to vector<16x1xf32>
    %108 = arith.addf %104, %107 : vector<16x1xf32>
    %109 = math.rsqrt %108 : vector<16x1xf32>
    %110 = vector.broadcast %109 : vector<16x1xf32> to vector<16x32xf32>
    %111 = arith.mulf %106, %110 : vector<16x32xf32>
    %112 = vector.broadcast %91 : vector<1x32xf32> to vector<16x32xf32>
    %113 = arith.mulf %111, %112 : vector<16x32xf32>
    %114 = vector.broadcast %93 : vector<1x32xf32> to vector<16x32xf32>
    %115 = arith.addf %113, %114 : vector<16x32xf32>
    %116 = arith.truncf %115 : vector<16x32xf32> to vector<16x32xbf16>
    %c0_42 = arith.constant 0 : index
    %c0_43 = arith.constant 0 : index
    %c0_44 = arith.constant 0 : index
    %117 = vector.load %arg11[%c0_42, %c0_43, %c0_44] : memref<2x32x64xbf16, #tpu.memory_space<vmem>>, vector<1x32x64xbf16>
    %118 = vector.shape_cast %117 : vector<1x32x64xbf16> to vector<32x64xbf16>
    %cst_45 = arith.constant dense<0.000000e+00> : vector<16x64xf32>
    %119 = tpu.matmul %116, %118, %cst_45 {dimension_numbers = #tpu.dot_dimension_numbers<[1], [0], [0], [1], [0, 0, 1, 1], [], []>} : vector<16x32xbf16>, vector<32x64xbf16>, vector<16x64xf32> -> vector<16x64xf32>
    %c0_46 = arith.constant 0 : index
    %c0_47 = arith.constant 0 : index
    %c0_48 = arith.constant 0 : index
    %120 = vector.load %arg12[%c0_46, %c0_47, %c0_48] : memref<2x1x64xf32, #tpu.memory_space<vmem>>, vector<1x1x64xf32>
    %121 = vector.shape_cast %120 : vector<1x1x64xf32> to vector<1x64xf32>
    %122 = vector.broadcast %121 : vector<1x64xf32> to vector<16x64xf32>
    %123 = arith.addf %119, %122 : vector<16x64xf32>
    %124 = arith.mulf %123, %123 : vector<16x64xf32>
    %125 = arith.mulf %123, %124 : vector<16x64xf32>
    %cst_49 = arith.constant 4.471500e-02 : f32
    %126 = vector.broadcast %cst_49 : f32 to vector<16x64xf32>
    %127 = arith.mulf %126, %125 : vector<16x64xf32>
    %128 = arith.addf %123, %127 : vector<16x64xf32>
    %cst_50 = arith.constant 0.797884583 : f32
    %129 = vector.broadcast %cst_50 : f32 to vector<16x64xf32>
    %130 = arith.mulf %129, %128 : vector<16x64xf32>
    %131 = math.tanh %130 : vector<16x64xf32>
    %cst_51 = arith.constant 1.000000e+00 : f32
    %132 = vector.broadcast %cst_51 : f32 to vector<16x64xf32>
    %133 = arith.addf %132, %131 : vector<16x64xf32>
    %cst_52 = arith.constant 5.000000e-01 : f32
    %134 = vector.broadcast %cst_52 : f32 to vector<16x64xf32>
    %135 = arith.mulf %134, %133 : vector<16x64xf32>
    %136 = arith.mulf %123, %135 : vector<16x64xf32>
    %137 = arith.truncf %136 : vector<16x64xf32> to vector<16x64xbf16>
    %c0_53 = arith.constant 0 : index
    %c0_54 = arith.constant 0 : index
    %c0_55 = arith.constant 0 : index
    %138 = vector.load %arg13[%c0_53, %c0_54, %c0_55] : memref<2x64x32xbf16, #tpu.memory_space<vmem>>, vector<1x64x32xbf16>
    %139 = vector.shape_cast %138 : vector<1x64x32xbf16> to vector<64x32xbf16>
    %cst_56 = arith.constant dense<0.000000e+00> : vector<16x32xf32>
    %140 = tpu.matmul %137, %139, %cst_56 {dimension_numbers = #tpu.dot_dimension_numbers<[1], [0], [0], [1], [0, 0, 1, 1], [], []>} : vector<16x64xbf16>, vector<64x32xbf16>, vector<16x32xf32> -> vector<16x32xf32>
    %c0_57 = arith.constant 0 : index
    %c0_58 = arith.constant 0 : index
    %c0_59 = arith.constant 0 : index
    %141 = vector.load %arg14[%c0_57, %c0_58, %c0_59] : memref<2x1x32xf32, #tpu.memory_space<vmem>>, vector<1x1x32xf32>
    %142 = vector.shape_cast %141 : vector<1x1x32xf32> to vector<1x32xf32>
    %143 = vector.broadcast %142 : vector<1x32xf32> to vector<16x32xf32>
    %144 = arith.addf %140, %143 : vector<16x32xf32>
    %145 = arith.addf %144, %115 : vector<16x32xf32>
    %c0_60 = arith.constant 0 : index
    %c0_61 = arith.constant 0 : index
    %c0_62 = arith.constant 0 : index
    %146 = vector.load %arg15[%c0_60, %c0_61, %c0_62] : memref<2x1x32xf32, #tpu.memory_space<vmem>>, vector<1x1x32xf32>
    %147 = vector.shape_cast %146 : vector<1x1x32xf32> to vector<1x32xf32>
    %c0_63 = arith.constant 0 : index
    %c0_64 = arith.constant 0 : index
    %c0_65 = arith.constant 0 : index
    %148 = vector.load %arg16[%c0_63, %c0_64, %c0_65] : memref<2x1x32xf32, #tpu.memory_space<vmem>>, vector<1x1x32xf32>
    %149 = vector.shape_cast %148 : vector<1x1x32xf32> to vector<1x32xf32>
    %cst_66 = arith.constant dense<0.000000e+00> : vector<16xf32>
    %150 = vector.multi_reduction <add>, %145, %cst_66 [1] : vector<16x32xf32> to vector<16xf32>
    %151 = vector.shape_cast %150 : vector<16xf32> to vector<16x1xf32>
    %cst_67 = arith.constant 3.200000e+01 : f32
    %152 = vector.broadcast %cst_67 : f32 to vector<16x1xf32>
    %153 = arith.divf %151, %152 : vector<16x1xf32>
    %154 = vector.broadcast %153 : vector<16x1xf32> to vector<16x32xf32>
    %155 = arith.subf %145, %154 : vector<16x32xf32>
    %156 = arith.mulf %155, %155 : vector<16x32xf32>
    %cst_68 = arith.constant dense<0.000000e+00> : vector<16xf32>
    %157 = vector.multi_reduction <add>, %156, %cst_68 [1] : vector<16x32xf32> to vector<16xf32>
    %158 = vector.shape_cast %157 : vector<16xf32> to vector<16x1xf32>
    %cst_69 = arith.constant 3.200000e+01 : f32
    %159 = vector.broadcast %cst_69 : f32 to vector<16x1xf32>
    %160 = arith.divf %158, %159 : vector<16x1xf32>
    %161 = vector.broadcast %153 : vector<16x1xf32> to vector<16x32xf32>
    %162 = arith.subf %145, %161 : vector<16x32xf32>
    %cst_70 = arith.constant 9.99999996E-13 : f32
    %163 = vector.broadcast %cst_70 : f32 to vector<16x1xf32>
    %164 = arith.addf %160, %163 : vector<16x1xf32>
    %165 = math.rsqrt %164 : vector<16x1xf32>
    %166 = vector.broadcast %165 : vector<16x1xf32> to vector<16x32xf32>
    %167 = arith.mulf %162, %166 : vector<16x32xf32>
    %168 = vector.broadcast %147 : vector<1x32xf32> to vector<16x32xf32>
    %169 = arith.mulf %167, %168 : vector<16x32xf32>
    %170 = vector.broadcast %149 : vector<1x32xf32> to vector<16x32xf32>
    %171 = arith.addf %169, %170 : vector<16x32xf32>
    %172 = arith.truncf %171 : vector<16x32xf32> to vector<16x32xbf16>
    %c1 = arith.constant 1 : index
    %c0_71 = arith.constant 0 : index
    %c0_72 = arith.constant 0 : index
    %173 = vector.load %arg5[%c1, %c0_71, %c0_72] : memref<2x32x96xbf16, #tpu.memory_space<vmem>>, vector<1x32x96xbf16>
    %174 = vector.shape_cast %173 : vector<1x32x96xbf16> to vector<32x96xbf16>
    %cst_73 = arith.constant dense<0.000000e+00> : vector<16x96xf32>
    %175 = tpu.matmul %172, %174, %cst_73 {dimension_numbers = #tpu.dot_dimension_numbers<[1], [0], [0], [1], [0, 0, 1, 1], [], []>} : vector<16x32xbf16>, vector<32x96xbf16>, vector<16x96xf32> -> vector<16x96xf32>
    %c1_74 = arith.constant 1 : index
    %c0_75 = arith.constant 0 : index
    %c0_76 = arith.constant 0 : index
    %176 = vector.load %arg6[%c1_74, %c0_75, %c0_76] : memref<2x1x96xf32, #tpu.memory_space<vmem>>, vector<1x1x96xf32>
    %177 = vector.shape_cast %176 : vector<1x1x96xf32> to vector<1x96xf32>
    %178 = vector.broadcast %177 : vector<1x96xf32> to vector<16x96xf32>
    %179 = arith.addf %175, %178 : vector<16x96xf32>
    %180 = vector.extract_strided_slice %179 {offsets = [0, 0], sizes = [16, 16], strides = [1, 1]} : vector<16x96xf32> to vector<16x16xf32>
    %181 = vector.extract_strided_slice %179 {offsets = [0, 32], sizes = [16, 16], strides = [1, 1]} : vector<16x96xf32> to vector<16x16xf32>
    %182 = vector.extract_strided_slice %179 {offsets = [0, 64], sizes = [16, 16], strides = [1, 1]} : vector<16x96xf32> to vector<16x16xf32>
    %183 = vector.extract_strided_slice %179 {offsets = [0, 16], sizes = [16, 16], strides = [1, 1]} : vector<16x96xf32> to vector<16x16xf32>
    %184 = vector.extract_strided_slice %179 {offsets = [0, 48], sizes = [16, 16], strides = [1, 1]} : vector<16x96xf32> to vector<16x16xf32>
    %185 = vector.extract_strided_slice %179 {offsets = [0, 80], sizes = [16, 16], strides = [1, 1]} : vector<16x96xf32> to vector<16x16xf32>
    %186 = vector.shape_cast %180 : vector<16x16xf32> to vector<1x16x16xf32>
    %187 = vector.shape_cast %183 : vector<16x16xf32> to vector<1x16x16xf32>
    %188 = tpu.concatenate %186, %187 in 0 : vector<1x16x16xf32>, vector<1x16x16xf32> -> vector<2x16x16xf32>
    %189 = arith.truncf %188 : vector<2x16x16xf32> to vector<2x16x16xbf16>
    %190 = vector.shape_cast %181 : vector<16x16xf32> to vector<1x16x16xf32>
    %191 = vector.shape_cast %184 : vector<16x16xf32> to vector<1x16x16xf32>
    %192 = tpu.concatenate %190, %191 in 0 : vector<1x16x16xf32>, vector<1x16x16xf32> -> vector<2x16x16xf32>
    %193 = arith.truncf %192 : vector<2x16x16xf32> to vector<2x16x16xbf16>
    %194 = vector.shape_cast %182 : vector<16x16xf32> to vector<1x16x16xf32>
    %195 = vector.shape_cast %185 : vector<16x16xf32> to vector<1x16x16xf32>
    %196 = tpu.concatenate %194, %195 in 0 : vector<1x16x16xf32>, vector<1x16x16xf32> -> vector<2x16x16xf32>
    %197 = arith.truncf %196 : vector<2x16x16xf32> to vector<2x16x16xbf16>
    "tpu.trace_start"() <{level = 10 : i32, message = "hqd,hkd->hqk"}> : () -> ()
    %cst_77 = arith.constant dense<0.000000e+00> : vector<2x16x16xf32>
    %198 = tpu.matmul %189, %193, %cst_77 {dimension_numbers = #tpu.dot_dimension_numbers<[2], [2], [1], [1], [0, 0, 0, 1, 1, 1], [0], [0]>} : vector<2x16x16xbf16>, vector<2x16x16xbf16>, vector<2x16x16xf32> -> vector<2x16x16xf32>
    "tpu.trace_stop"() : () -> ()
    %cst_78 = arith.constant 2.500000e-01 : f32
    %199 = vector.broadcast %cst_78 : f32 to vector<2x16x16xf32>
    %200 = arith.mulf %198, %199 : vector<2x16x16xf32>
    %201 = vector.shape_cast %6 : vector<16x16xf32> to vector<1x16x16xf32>
    %202 = vector.broadcast %201 : vector<1x16x16xf32> to vector<2x16x16xf32>
    %203 = arith.addf %200, %202 : vector<2x16x16xf32>
    %cst_79 = arith.constant dense<0xFF800000> : vector<2x16xf32>
    %204 = vector.multi_reduction <maximumf>, %203, %cst_79 [2] : vector<2x16x16xf32> to vector<2x16xf32>
    %205 = vector.shape_cast %204 : vector<2x16xf32> to vector<2x16x1xf32>
    %206 = vector.broadcast %205 : vector<2x16x1xf32> to vector<2x16x16xf32>
    %207 = arith.subf %203, %206 : vector<2x16x16xf32>
    %208 = math.exp %207 : vector<2x16x16xf32>
    %cst_80 = arith.constant dense<0.000000e+00> : vector<2x16xf32>
    %209 = vector.multi_reduction <add>, %208, %cst_80 [2] : vector<2x16x16xf32> to vector<2x16xf32>
    %210 = vector.shape_cast %209 : vector<2x16xf32> to vector<2x16x1xf32>
    %211 = tpu.reciprocal %210 {approx = true} : vector<2x16x1xf32> -> vector<2x16x1xf32>
    %212 = vector.broadcast %211 : vector<2x16x1xf32> to vector<2x16x16xf32>
    %213 = arith.mulf %208, %212 : vector<2x16x16xf32>
    %214 = arith.truncf %213 : vector<2x16x16xf32> to vector<2x16x16xbf16>
    "tpu.trace_start"() <{level = 10 : i32, message = "hqk,hkd->hqd"}> : () -> ()
    %cst_81 = arith.constant dense<0.000000e+00> : vector<2x16x16xf32>
    %215 = tpu.matmul %214, %197, %cst_81 {dimension_numbers = #tpu.dot_dimension_numbers<[2], [1], [1], [2], [0, 0, 0, 1, 1, 2], [0], [0]>} : vector<2x16x16xbf16>, vector<2x16x16xbf16>, vector<2x16x16xf32> -> vector<2x16x16xf32>
    "tpu.trace_stop"() : () -> ()
    %216 = vector.extract_strided_slice %215 {offsets = [0, 0, 0], sizes = [1, 16, 16], strides = [1, 1, 1]} : vector<2x16x16xf32> to vector<1x16x16xf32>
    %217 = vector.shape_cast %216 : vector<1x16x16xf32> to vector<16x16xf32>
    %218 = vector.extract_strided_slice %215 {offsets = [1, 0, 0], sizes = [1, 16, 16], strides = [1, 1, 1]} : vector<2x16x16xf32> to vector<1x16x16xf32>
    %219 = vector.shape_cast %218 : vector<1x16x16xf32> to vector<16x16xf32>
    %220 = tpu.concatenate %217, %219 in 1 : vector<16x16xf32>, vector<16x16xf32> -> vector<16x32xf32>
    %221 = arith.truncf %220 : vector<16x32xf32> to vector<16x32xbf16>
    %c1_82 = arith.constant 1 : index
    %c0_83 = arith.constant 0 : index
    %c0_84 = arith.constant 0 : index
    %222 = vector.load %arg7[%c1_82, %c0_83, %c0_84] : memref<2x32x32xbf16, #tpu.memory_space<vmem>>, vector<1x32x32xbf16>
    %223 = vector.shape_cast %222 : vector<1x32x32xbf16> to vector<32x32xbf16>
    %cst_85 = arith.constant dense<0.000000e+00> : vector<16x32xf32>
    %224 = tpu.matmul %221, %223, %cst_85 {dimension_numbers = #tpu.dot_dimension_numbers<[1], [0], [0], [1], [0, 0, 1, 1], [], []>} : vector<16x32xbf16>, vector<32x32xbf16>, vector<16x32xf32> -> vector<16x32xf32>
    %c1_86 = arith.constant 1 : index
    %c0_87 = arith.constant 0 : index
    %c0_88 = arith.constant 0 : index
    %225 = vector.load %arg8[%c1_86, %c0_87, %c0_88] : memref<2x1x32xf32, #tpu.memory_space<vmem>>, vector<1x1x32xf32>
    %226 = vector.shape_cast %225 : vector<1x1x32xf32> to vector<1x32xf32>
    %227 = vector.broadcast %226 : vector<1x32xf32> to vector<16x32xf32>
    %228 = arith.addf %224, %227 : vector<16x32xf32>
    %229 = arith.addf %228, %171 : vector<16x32xf32>
    %c1_89 = arith.constant 1 : index
    %c0_90 = arith.constant 0 : index
    %c0_91 = arith.constant 0 : index
    %230 = vector.load %arg9[%c1_89, %c0_90, %c0_91] : memref<2x1x32xf32, #tpu.memory_space<vmem>>, vector<1x1x32xf32>
    %231 = vector.shape_cast %230 : vector<1x1x32xf32> to vector<1x32xf32>
    %c1_92 = arith.constant 1 : index
    %c0_93 = arith.constant 0 : index
    %c0_94 = arith.constant 0 : index
    %232 = vector.load %arg10[%c1_92, %c0_93, %c0_94] : memref<2x1x32xf32, #tpu.memory_space<vmem>>, vector<1x1x32xf32>
    %233 = vector.shape_cast %232 : vector<1x1x32xf32> to vector<1x32xf32>
    %cst_95 = arith.constant dense<0.000000e+00> : vector<16xf32>
    %234 = vector.multi_reduction <add>, %229, %cst_95 [1] : vector<16x32xf32> to vector<16xf32>
    %235 = vector.shape_cast %234 : vector<16xf32> to vector<16x1xf32>
    %cst_96 = arith.constant 3.200000e+01 : f32
    %236 = vector.broadcast %cst_96 : f32 to vector<16x1xf32>
    %237 = arith.divf %235, %236 : vector<16x1xf32>
    %238 = vector.broadcast %237 : vector<16x1xf32> to vector<16x32xf32>
    %239 = arith.subf %229, %238 : vector<16x32xf32>
    %240 = arith.mulf %239, %239 : vector<16x32xf32>
    %cst_97 = arith.constant dense<0.000000e+00> : vector<16xf32>
    %241 = vector.multi_reduction <add>, %240, %cst_97 [1] : vector<16x32xf32> to vector<16xf32>
    %242 = vector.shape_cast %241 : vector<16xf32> to vector<16x1xf32>
    %cst_98 = arith.constant 3.200000e+01 : f32
    %243 = vector.broadcast %cst_98 : f32 to vector<16x1xf32>
    %244 = arith.divf %242, %243 : vector<16x1xf32>
    %245 = vector.broadcast %237 : vector<16x1xf32> to vector<16x32xf32>
    %246 = arith.subf %229, %245 : vector<16x32xf32>
    %cst_99 = arith.constant 9.99999996E-13 : f32
    %247 = vector.broadcast %cst_99 : f32 to vector<16x1xf32>
    %248 = arith.addf %244, %247 : vector<16x1xf32>
    %249 = math.rsqrt %248 : vector<16x1xf32>
    %250 = vector.broadcast %249 : vector<16x1xf32> to vector<16x32xf32>
    %251 = arith.mulf %246, %250 : vector<16x32xf32>
    %252 = vector.broadcast %231 : vector<1x32xf32> to vector<16x32xf32>
    %253 = arith.mulf %251, %252 : vector<16x32xf32>
    %254 = vector.broadcast %233 : vector<1x32xf32> to vector<16x32xf32>
    %255 = arith.addf %253, %254 : vector<16x32xf32>
    %256 = arith.truncf %255 : vector<16x32xf32> to vector<16x32xbf16>
    %c1_100 = arith.constant 1 : index
    %c0_101 = arith.constant 0 : index
    %c0_102 = arith.constant 0 : index
    %257 = vector.load %arg11[%c1_100, %c0_101, %c0_102] : memref<2x32x64xbf16, #tpu.memory_space<vmem>>, vector<1x32x64xbf16>
    %258 = vector.shape_cast %257 : vector<1x32x64xbf16> to vector<32x64xbf16>
    %cst_103 = arith.constant dense<0.000000e+00> : vector<16x64xf32>
    %259 = tpu.matmul %256, %258, %cst_103 {dimension_numbers = #tpu.dot_dimension_numbers<[1], [0], [0], [1], [0, 0, 1, 1], [], []>} : vector<16x32xbf16>, vector<32x64xbf16>, vector<16x64xf32> -> vector<16x64xf32>
    %c1_104 = arith.constant 1 : index
    %c0_105 = arith.constant 0 : index
    %c0_106 = arith.constant 0 : index
    %260 = vector.load %arg12[%c1_104, %c0_105, %c0_106] : memref<2x1x64xf32, #tpu.memory_space<vmem>>, vector<1x1x64xf32>
    %261 = vector.shape_cast %260 : vector<1x1x64xf32> to vector<1x64xf32>
    %262 = vector.broadcast %261 : vector<1x64xf32> to vector<16x64xf32>
    %263 = arith.addf %259, %262 : vector<16x64xf32>
    %264 = arith.mulf %263, %263 : vector<16x64xf32>
    %265 = arith.mulf %263, %264 : vector<16x64xf32>
    %cst_107 = arith.constant 4.471500e-02 : f32
    %266 = vector.broadcast %cst_107 : f32 to vector<16x64xf32>
    %267 = arith.mulf %266, %265 : vector<16x64xf32>
    %268 = arith.addf %263, %267 : vector<16x64xf32>
    %cst_108 = arith.constant 0.797884583 : f32
    %269 = vector.broadcast %cst_108 : f32 to vector<16x64xf32>
    %270 = arith.mulf %269, %268 : vector<16x64xf32>
    %271 = math.tanh %270 : vector<16x64xf32>
    %cst_109 = arith.constant 1.000000e+00 : f32
    %272 = vector.broadcast %cst_109 : f32 to vector<16x64xf32>
    %273 = arith.addf %272, %271 : vector<16x64xf32>
    %cst_110 = arith.constant 5.000000e-01 : f32
    %274 = vector.broadcast %cst_110 : f32 to vector<16x64xf32>
    %275 = arith.mulf %274, %273 : vector<16x64xf32>
    %276 = arith.mulf %263, %275 : vector<16x64xf32>
    %277 = arith.truncf %276 : vector<16x64xf32> to vector<16x64xbf16>
    %c1_111 = arith.constant 1 : index
    %c0_112 = arith.constant 0 : index
    %c0_113 = arith.constant 0 : index
    %278 = vector.load %arg13[%c1_111, %c0_112, %c0_113] : memref<2x64x32xbf16, #tpu.memory_space<vmem>>, vector<1x64x32xbf16>
    %279 = vector.shape_cast %278 : vector<1x64x32xbf16> to vector<64x32xbf16>
    %cst_114 = arith.constant dense<0.000000e+00> : vector<16x32xf32>
    %280 = tpu.matmul %277, %279, %cst_114 {dimension_numbers = #tpu.dot_dimension_numbers<[1], [0], [0], [1], [0, 0, 1, 1], [], []>} : vector<16x64xbf16>, vector<64x32xbf16>, vector<16x32xf32> -> vector<16x32xf32>
    %c1_115 = arith.constant 1 : index
    %c0_116 = arith.constant 0 : index
    %c0_117 = arith.constant 0 : index
    %281 = vector.load %arg14[%c1_115, %c0_116, %c0_117] : memref<2x1x32xf32, #tpu.memory_space<vmem>>, vector<1x1x32xf32>
    %282 = vector.shape_cast %281 : vector<1x1x32xf32> to vector<1x32xf32>
    %283 = vector.broadcast %282 : vector<1x32xf32> to vector<16x32xf32>
    %284 = arith.addf %280, %283 : vector<16x32xf32>
    %285 = arith.addf %284, %255 : vector<16x32xf32>
    %c1_118 = arith.constant 1 : index
    %c0_119 = arith.constant 0 : index
    %c0_120 = arith.constant 0 : index
    %286 = vector.load %arg15[%c1_118, %c0_119, %c0_120] : memref<2x1x32xf32, #tpu.memory_space<vmem>>, vector<1x1x32xf32>
    %287 = vector.shape_cast %286 : vector<1x1x32xf32> to vector<1x32xf32>
    %c1_121 = arith.constant 1 : index
    %c0_122 = arith.constant 0 : index
    %c0_123 = arith.constant 0 : index
    %288 = vector.load %arg16[%c1_121, %c0_122, %c0_123] : memref<2x1x32xf32, #tpu.memory_space<vmem>>, vector<1x1x32xf32>
    %289 = vector.shape_cast %288 : vector<1x1x32xf32> to vector<1x32xf32>
    %cst_124 = arith.constant dense<0.000000e+00> : vector<16xf32>
    %290 = vector.multi_reduction <add>, %285, %cst_124 [1] : vector<16x32xf32> to vector<16xf32>
    %291 = vector.shape_cast %290 : vector<16xf32> to vector<16x1xf32>
    %cst_125 = arith.constant 3.200000e+01 : f32
    %292 = vector.broadcast %cst_125 : f32 to vector<16x1xf32>
    %293 = arith.divf %291, %292 : vector<16x1xf32>
    %294 = vector.broadcast %293 : vector<16x1xf32> to vector<16x32xf32>
    %295 = arith.subf %285, %294 : vector<16x32xf32>
    %296 = arith.mulf %295, %295 : vector<16x32xf32>
    %cst_126 = arith.constant dense<0.000000e+00> : vector<16xf32>
    %297 = vector.multi_reduction <add>, %296, %cst_126 [1] : vector<16x32xf32> to vector<16xf32>
    %298 = vector.shape_cast %297 : vector<16xf32> to vector<16x1xf32>
    %cst_127 = arith.constant 3.200000e+01 : f32
    %299 = vector.broadcast %cst_127 : f32 to vector<16x1xf32>
    %300 = arith.divf %298, %299 : vector<16x1xf32>
    %301 = vector.broadcast %293 : vector<16x1xf32> to vector<16x32xf32>
    %302 = arith.subf %285, %301 : vector<16x32xf32>
    %cst_128 = arith.constant 9.99999996E-13 : f32
    %303 = vector.broadcast %cst_128 : f32 to vector<16x1xf32>
    %304 = arith.addf %300, %303 : vector<16x1xf32>
    %305 = math.rsqrt %304 : vector<16x1xf32>
    %306 = vector.broadcast %305 : vector<16x1xf32> to vector<16x32xf32>
    %307 = arith.mulf %302, %306 : vector<16x32xf32>
    %308 = vector.broadcast %287 : vector<1x32xf32> to vector<16x32xf32>
    %309 = arith.mulf %307, %308 : vector<16x32xf32>
    %310 = vector.broadcast %289 : vector<1x32xf32> to vector<16x32xf32>
    %311 = arith.addf %309, %310 : vector<16x32xf32>
    %c0_129 = arith.constant 0 : index
    %c0_130 = arith.constant 0 : index
    %312 = vector.load %arg17[%c0_129, %c0_130] : memref<16x32xf32, #tpu.memory_space<vmem>>, vector<16x32xf32>
    tpu.vector_store %arg17[%c0_129, %c0_130], %311 {strides = array<i32>} : memref<16x32xf32, #tpu.memory_space<vmem>>, vector<16x32xf32>,
    return
  }
  func.func @transform_0(%arg0: i32, %arg1: memref<1xi32, #tpu.memory_space<smem>>) -> (i32, i32) {
    %c0_i32 = arith.constant 0 : i32
    %c0_i32_0 = arith.constant 0 : i32
    return %arg0, %c0_i32 : i32, i32
  }
  func.func @transform_1(%arg0: i32, %arg1: memref<1xi32, #tpu.memory_space<smem>>) -> (i32, i32) {
    %c0_i32 = arith.constant 0 : i32
    %c0_i32_0 = arith.constant 0 : i32
    %c0_i32_1 = arith.constant 0 : i32
    return %c0_i32, %c0_i32_0 : i32, i32
  }
  func.func @transform_2(%arg0: i32, %arg1: memref<1xi32, #tpu.memory_space<smem>>) -> (i32, i32) {
    %c0_i32 = arith.constant 0 : i32
    %c0_i32_0 = arith.constant 0 : i32
    %c0_i32_1 = arith.constant 0 : i32
    return %c0_i32, %c0_i32_0 : i32, i32
  }
  func.func @transform_3(%arg0: i32, %arg1: memref<1xi32, #tpu.memory_space<smem>>) -> (i32, i32, i32) {
    %c0_i32 = arith.constant 0 : i32
    %c0_i32_0 = arith.constant 0 : i32
    %c0_i32_1 = arith.constant 0 : i32
    %c0_i32_2 = arith.constant 0 : i32
    return %c0_i32, %c0_i32_0, %c0_i32_1 : i32, i32, i32
  }
  func.func @transform_4(%arg0: i32, %arg1: memref<1xi32, #tpu.memory_space<smem>>) -> (i32, i32, i32) {
    %c0_i32 = arith.constant 0 : i32
    %c0_i32_0 = arith.constant 0 : i32
    %c0_i32_1 = arith.constant 0 : i32
    %c0_i32_2 = arith.constant 0 : i32
    return %c0_i32, %c0_i32_0, %c0_i32_1 : i32, i32, i32
  }
  func.func @transform_5(%arg0: i32, %arg1: memref<1xi32, #tpu.memory_space<smem>>) -> (i32, i32, i32) {
    %c0_i32 = arith.constant 0 : i32
    %c0_i32_0 = arith.constant 0 : i32
    %c0_i32_1 = arith.constant 0 : i32
    %c0_i32_2 = arith.constant 0 : i32
    return %c0_i32, %c0_i32_0, %c0_i32_1 : i32, i32, i32
  }
  func.func @transform_6(%arg0: i32, %arg1: memref<1xi32, #tpu.memory_space<smem>>) -> (i32, i32, i32) {
    %c0_i32 = arith.constant 0 : i32
    %c0_i32_0 = arith.constant 0 : i32
    %c0_i32_1 = arith.constant 0 : i32
    %c0_i32_2 = arith.constant 0 : i32
    return %c0_i32, %c0_i32_0, %c0_i32_1 : i32, i32, i32
  }
  func.func @transform_7(%arg0: i32, %arg1: memref<1xi32, #tpu.memory_space<smem>>) -> (i32, i32, i32) {
    %c0_i32 = arith.constant 0 : i32
    %c0_i32_0 = arith.constant 0 : i32
    %c0_i32_1 = arith.constant 0 : i32
    %c0_i32_2 = arith.constant 0 : i32
    return %c0_i32, %c0_i32_0, %c0_i32_1 : i32, i32, i32
  }
  func.func @transform_8(%arg0: i32, %arg1: memref<1xi32, #tpu.memory_space<smem>>) -> (i32, i32, i32) {
    %c0_i32 = arith.constant 0 : i32
    %c0_i32_0 = arith.constant 0 : i32
    %c0_i32_1 = arith.constant 0 : i32
    %c0_i32_2 = arith.constant 0 : i32
    return %c0_i32, %c0_i32_0, %c0_i32_1 : i32, i32, i32
  }
  func.func @transform_9(%arg0: i32, %arg1: memref<1xi32, #tpu.memory_space<smem>>) -> (i32, i32, i32) {
    %c0_i32 = arith.constant 0 : i32
    %c0_i32_0 = arith.constant 0 : i32
    %c0_i32_1 = arith.constant 0 : i32
    %c0_i32_2 = arith.constant 0 : i32
    return %c0_i32, %c0_i32_0, %c0_i32_1 : i32, i32, i32
  }
  func.func @transform_10(%arg0: i32, %arg1: memref<1xi32, #tpu.memory_space<smem>>) -> (i32, i32, i32) {
    %c0_i32 = arith.constant 0 : i32
    %c0_i32_0 = arith.constant 0 : i32
    %c0_i32_1 = arith.constant 0 : i32
    %c0_i32_2 = arith.constant 0 : i32
    return %c0_i32, %c0_i32_0, %c0_i32_1 : i32, i32, i32
  }
  func.func @transform_11(%arg0: i32, %arg1: memref<1xi32, #tpu.memory_space<smem>>) -> (i32, i32, i32) {
    %c0_i32 = arith.constant 0 : i32
    %c0_i32_0 = arith.constant 0 : i32
    %c0_i32_1 = arith.constant 0 : i32
    %c0_i32_2 = arith.constant 0 : i32
    return %c0_i32, %c0_i32_0, %c0_i32_1 : i32, i32, i32
  }
  func.func @transform_12(%arg0: i32, %arg1: memref<1xi32, #tpu.memory_space<smem>>) -> (i32, i32, i32) {
    %c0_i32 = arith.constant 0 : i32
    %c0_i32_0 = arith.constant 0 : i32
    %c0_i32_1 = arith.constant 0 : i32
    %c0_i32_2 = arith.constant 0 : i32
    return %c0_i32, %c0_i32_0, %c0_i32_1 : i32, i32, i32
  }
  func.func @transform_13(%arg0: i32, %arg1: memref<1xi32, #tpu.memory_space<smem>>) -> (i32, i32, i32) {
    %c0_i32 = arith.constant 0 : i32
    %c0_i32_0 = arith.constant 0 : i32
    %c0_i32_1 = arith.constant 0 : i32
    %c0_i32_2 = arith.constant 0 : i32
    return %c0_i32, %c0_i32_0, %c0_i32_1 : i32, i32, i32
  }
  func.func @transform_14(%arg0: i32, %arg1: memref<1xi32, #tpu.memory_space<smem>>) -> (i32, i32, i32) {
    %c0_i32 = arith.constant 0 : i32
    %c0_i32_0 = arith.constant 0 : i32
    %c0_i32_1 = arith.constant 0 : i32
    %c0_i32_2 = arith.constant 0 : i32
    return %c0_i32, %c0_i32_0, %c0_i32_1 : i32, i32, i32
  }
  func.func @transform_15(%arg0: i32, %arg1: memref<1xi32, #tpu.memory_space<smem>>) -> (i32, i32) {
    %c0_i32 = arith.constant 0 : i32
    %c0_i32_0 = arith.constant 0 : i32
    return %arg0, %c0_i32 : i32, i32
  }
}

</mosaic_0001>

<bundles_post_ra>
// kernel: wp_encoder_forward.1
= control target key start
LH: loop header
LB: loop body
LE: loop exit
PB: predicated region body
PF: predicated region fallthrough
CT: control target
= control target key end

     0   :  { %s2434_s24 = smov 0   ;;  %s2752_s0 = inlined_call_operand.<no memory space> [shape: s32[1], index: 0, kind: input, shape index: {}]   ;;  %s2753_s1 = inlined_call_operand.vmem [shape: f32[32,32], index: 1, kind: input, shape index: {}]   ;;  %s2754_s2 = inlined_call_operand.vmem [shape: f32[1,32], index: 2, kind: input, shape index: {}]   ;;  %s2755_s3 = inlined_call_operand.vmem [shape: f32[1,32], index: 3, kind: input, shape index: {}]   ;;  %s2756_s4 = inlined_call_operand.vmem [shape: bf16[2,32,96], index: 4, kind: input, shape index: {}]   ;;  %s2757_s5 = inlined_call_operand.vmem [shape: f32[2,1,96], index: 5, kind: input, shape index: {}]   ;;  %s2758_s6 = inlined_call_operand.vmem [shape: bf16[2,32,32], index: 6, kind: input, shape index: {}]   ;;  %s2759_s7 = inlined_call_operand.vmem [shape: f32[2,1,32], index: 7, kind: input, shape index: {}]   ;;  %s2760_s8 = inlined_call_operand.vmem [shape: f32[2,1,32], index: 8, kind: input, shape index: {}]   ;;  %s2761_s9 = inlined_call_operand.vmem [shape: f32[2,1,32], index: 9, kind: input, shape index: {}]   ;;  %s2762_s10 = inlined_call_operand.vmem [shape: bf16[2,32,64], index: 10, kind: input, shape index: {}]   ;;  %s2763_s11 = inlined_call_operand.vmem [shape: f32[2,1,64], index: 11, kind: input, shape index: {}]   ;;  %s2764_s12 = inlined_call_operand.vmem [shape: bf16[2,64,32], index: 12, kind: input, shape index: {}]   ;;  %s2765_s13 = inlined_call_operand.vmem [shape: f32[2,1,32], index: 13, kind: input, shape index: {}]   ;;  %s2766_s14 = inlined_call_operand.vmem [shape: f32[2,1,32], index: 14, kind: input, shape index: {}]   ;;  %s2767_s15 = inlined_call_operand.vmem [shape: f32[2,1,32], index: 15, kind: input, shape index: {}]   ;;  %s2768_s16 = inlined_call_operand.vmem [shape: f32[32,32], index: 16, kind: output, shape index: {}]  }
   0x1   :  { %2769 = sst [smem:[#allocation4_spill]] %s2752_s0 }
   0x2   :  { %s2770_s23 = sld [smem:[#allocation4_spill]] }
   0x8   :  { %21 = sst [smem:[#allocation3]] %s2770_s23 }
   0x9 LB: > { %s1959_s25 = sadd.s32 4294967295, %s2337_s24   ;;  %p1963_p0 = scmp.ge.s32.totalorder %s2337_s24, 1  ;;  %s2337_s24 = sphi %s2434_s24, %s27_s24  }
   0xa   : > { %p440_p1 = scmp.lt.s32.totalorder %s2337_s24, 3 }
   0xc   : > { %p441_p2 = pnand %p1963_p0, %p440_p1 }
   0xd   : > { %s1964_s26 = sshll.u32 (!%p441_p2), %s1959_s25, 1  ;;  %vm511_vm0 = vcmask (!%p441_p2), 261120   ;;  %v2251_v14 = vld [vmem:[%s2756_s4] sm:$0xff] (!%p441_p2)   ;;  %v2339_v15 = vmov (!%p441_p2), 0.0   ;;  %v2252_v16 = vld [vmem:[%s2756_s4 + $0x8] sm:$0xff] (!%p441_p2)   ;;  %vm2340_vm1 = vmmov (!%p441_p2), 0   ;;  %v502_v51 = vlaneseq (!%p441_p2) }
   0xe   : > { %444 = sbr.rel (%p441_p2) target bundleno = 5629 (0x15fd), region = 80  ;;  %p489_p3 = scmp.lt.s32.totalorder (!%p441_p2), %s1964_s26, 3  ;;  %2096 = vmatprep.subr.bf16.mxu1 (!%p441_p2), %v2339_v15  ;;  %2110 = vmatprep.subr.bf16.mxu0 (!%p441_p2), %v2339_v15  ;;  %v1968_v25 = vld [vmem:[%s2754_s2] ss:$0 sm:$0xff] (!%p441_p2)  ;;  %vm636_vm2 = vcmask (!%p441_p2), 130048   ;;  %vm1132_vm4 = vcmask (!%p441_p2), 523264  }
   0xf   : > { %2097 = vmatpush3.bf16.msra.mxu1 (!%p441_p2), %v2251_v14  ;;  %2100 = vmatprep.mubr.msk.bf16.mxu1 (!%p441_p2), %vm2340_vm1, %v2339_v15  ;;  %v1969_v29 = vld [vmem:[%s2755_s3] ss:$0 sm:$0xff] (!%p441_p2)  ;;  %s2341_s29 = smov (!%p441_p2), 112   ;;  %s501_s0 = sld [smem:[#allocation3]] (!%p441_p2)  ;;  %v503_v52 = vand.u32 (!%p441_p2), 127, %v502_v51 }
  0x10   : > { %2098 = vmatprep.subr.bf16.mxu1 (!%p441_p2), %v2339_v15  ;;  %2112 = vmatprep.mubr.msk.bf16.mxu0 (!%p441_p2), %vm2340_vm1, %v2339_v15  ;;  %v1970_v34 = vld [vmem:[%s2757_s5] ss:$0 sm:$0xff] (!%p441_p2)  ;;  %v2343_v55 = vmov (!%p441_p2), -1e+09   ;;  %s2344_s17 = smov (!%p441_p2), 64   ;;  %s2345_s22 = smov (!%p441_p2), 16  }
  0x11   : > { %v2253_v51 = vld [vmem:[%s2758_s6] sm:$0xff] (!%p441_p2)  }
  0x13   : > { %2099 = vmatpush3.bf16.msra.mxu1 (!%p441_p2), %v2252_v16 }
  0x14   : > { %2104 = vmatprep.subr.bf16.mxu1 (!%p441_p2), %v2339_v15 }
  0x15   : > { %s2772_s26 = smov (!%p489_p3, %s1964_s26), 3  ;;  %v504_v53 = vstv %s501_s0 }
  0x16   : > { %s1965_s27 = sshll.u32 %s2772_s26, 3  ;;  %vm505_vm3 = vcmp.lt.s32.totalorder %v503_v52, %v504_v53  ;;  %v2254_v52 = vld [vmem:[%s2758_s6 + $0x8] sm:$0xff]  }
  0x17   : > { %s492_s30 = scalar_lea.vmem %s2753_s1, %s1965_s27  ;;  %v2507_v56 = vsel %vm505_vm3, 0.0, %v2343_v55  ;;  %s498_s18 = scalar_lea.vmem %s2768_s16, %s1965_s27 }
  0x18   : > { %v507_v0 = vld [vmem:[%s492_s30] sm:$0xff]  ;;  %v508_v1 = vld [vmem:[%s492_s30 + $0x8] sm:$0xff]  ;;  %s2342_s30 = smov 96  }
  0x19   : > { %v512_v2 = vsel %vm511_vm0, %v507_v0, 0.0  ;;  %v515_v3 = vsel %vm511_vm0, %v508_v1, 0.0 }
  0x1a   : > { %513 = vadd.xlane.f32.xlu0 %v512_v2 }
  0x1e   : > { %516 = vadd.xlane.f32.xlu0 %v515_v3 }
  0xa7   : > { %v514_v4 = vpop.xlane.xlu0 %513 }
  0xa8   : > { %v519_v5 = vmul.f32 0.03125, %v514_v4 }
  0xaa   : > { %v521_v6 = vsub.f32 %v507_v0, %v519_v5 }
  0xab   : > { %v517_v7 = vpop.xlane.xlu0 %516 }
  0xac   : > { %v520_v8 = vmul.f32 0.03125, %v517_v7  ;;  %v523_v9 = vmul.f32 %v521_v6, %v521_v6 }
  0xae   : > { %v522_v10 = vsub.f32 %v508_v1, %v520_v8  ;;  %v525_v11 = vsel %vm511_vm0, %v523_v9, 0.0 }
  0xaf   : > { %526 = vadd.xlane.f32.xlu1 %v525_v11 }
  0xb0   : > { %v524_v12 = vmul.f32 %v522_v10, %v522_v10 }
  0xb2   : > { %v528_v13 = vsel %vm511_vm0, %v524_v12, 0.0 }
  0xb3   : > { %529 = vadd.xlane.f32.xlu1 %v528_v13 }
 0x13c   : > { %v527_v17 = vpop.xlane.xlu1 %526 }
 0x13d   : > { %v531_v18 = vmul.f32 0.03125, %v527_v17 }
 0x13f   : > { %v533_v19 = vadd.f32 1e-12, %v531_v18 }
 0x140   : > { %v530_v20 = vpop.xlane.xlu1 %529 }
 0x141   : > { %2271 = vrsqrt.f32 %v533_v19  ;;  %v532_v21 = vmul.f32 0.03125, %v530_v20 }
 0x143   : > { %v534_v22 = vadd.f32 1e-12, %v532_v21 }
 0x145   : > { %2273 = vrsqrt.f32 %v534_v22 }
 0x14b   : > { %v2272_v23 = vpop.eup %2271 }
 0x14c   : > { %v537_v24 = vmul.f32 %v2272_v23, %v521_v6 }
 0x14e   : > { %v545_v28 = vmul.f32 %v1968_v25, %v537_v24 }
 0x14f   : > { %v2274_v26 = vpop.eup %2273 }
 0x150   : > { %v538_v27 = vmul.f32 %v2274_v26, %v522_v10  ;;  %v2474_v31 = vadd.f32 %v1969_v29, %v545_v28 }
 0x152   : > { %v546_v30 = vmul.f32 %v1968_v25, %v538_v27 }
 0x154   : > { %v2476_v32 = vadd.f32 %v1969_v29, %v546_v30 }
 0x156   : > { %v555_v33 = vpack.c.bf16 %v2476_v32, %v2474_v31 }
 0x158   : > { %2101 = vmatmul.mubr.msk.bf16.vlgmr.msra.gmra.mrb[0].mxu1 %vm511_vm0, %v555_v33 }
 0x159   : > { %2106 = vmatprep.mubr.msk.bf16.mxu1 %vm2340_vm1, %v2339_v15 }
 0x22b   : > { %v616_v35 = vpop.f32.mrb[0].mxu1 }
 0x22c   : > { %v2102_v36 = vpop.f32.mrb[1].mxu1  ;;  %v617_v38 = vadd.f32 %v1970_v34, %v616_v35 }
 0x22d   : > { %v619_v37 = vpop.f32.mrb[2].mxu1 }
 0x22e   : > { %v620_v39 = vadd.f32 %v1970_v34, %v619_v37  ;;  %v2103_v40 = vpop.f32.mrb[3].mxu1 }
 0x230   : > { %v2231_v41 = vpack.i.bf16 %v620_v39, %v617_v38  ;;  %v2486_v42 = vpack.c.bf16 %v620_v39, %v617_v38 }
 0x232   : > { %2232 = vrot.lane.b32.xlu0 %v2231_v41, %s2341_s29 }
 0x2a4   : > { %v2233_v43 = vpop.permute.xlu0 %2232 }
 0x2a5   : > { %v2235_v44 = vunpack.i.h.bf16 %v2233_v43  ;;  %v2234_v45 = vunpack.i.l.bf16 %v2233_v43 }
 0x2a7   : > { %v2489_v46 = vpack.c.bf16 %v2235_v44, %v2234_v45 }
 0x2a9   : > { %685 = vrot.lane.b32.xlu1 %v2489_v46, %s2342_s30 }
 0x2ad   : > { %634 = vrot.lane.b32.xlu1 %v2486_v42, %s2342_s30 }
 0x31b   : > { %v686_v47 = vpop.permute.xlu1 %685 }
 0x31c   : > { %v691_v48 = vsel %vm636_vm2, %v686_v47, 0 }
 0x31d   : > { %2111 = vmatpush3.bf16.xpose.msra.mxu0 %v691_v48 }
 0x31e   : > { %2122 = vmatprep.subr.bf16.mxu0 %v2339_v15 }
 0x31f   : > { %v635_v49 = vpop.permute.xlu1 %634 }
 0x320   : > { %v641_v50 = vsel %vm636_vm2, %v635_v49, 0 }
 0x321   : > { %2105 = vmatpush3.bf16.xpose.msra.mxu1 %v641_v50 }
 0x322   : > { %2116 = vmatprep.subr.bf16.mxu1 %v2339_v15 }
 0x324   : > { %2113 = vmatmul.mubr.msk.bf16.vlgmr.msra.gmra.mrb[0].mxu0 %vm636_vm2, %v2489_v46 }
 0x325   : > { %2124 = vmatprep.mubr.msk.bf16.mxu0 %vm2340_vm1, %v2339_v15 }
 0x328   : > { %2107 = vmatmul.mubr.msk.bf16.vlgmr.msra.gmra.mrb[4].mxu1 %vm636_vm2, %v2486_v42 }
 0x329   : > { %2118 = vmatprep.mubr.msk.bf16.mxu1 %vm2340_vm1, %v2339_v15 }
 0x3f7   : > { %v727_v54 = vpop.f32.mrb[0].mxu0 }
 0x3f8   : > { %v736_v57 = vmul.f32 0.25, %v727_v54  ;;  %v2114_v58 = vpop.f32.mrb[1].mxu0 }
 0x3f9   : > { %v730_v59 = vpop.f32.mrb[2].mxu0 }
 0x3fa   : > { %v737_v60 = vmul.f32 0.25, %v730_v59  ;;  %v2115_v61 = vpop.f32.mrb[3].mxu0  ;;  %v740_v62 = vadd.f32 %v736_v57, %v2507_v56 }
 0x3fb   : > { %v677_v63 = vpop.f32.mrb[4].mxu1 }
 0x3fc   : > { %v734_v0 = vmul.f32 0.25, %v677_v63  ;;  %v2108_v1 = vpop.f32.mrb[5].mxu1  ;;  %v748_v2 = vsel %vm636_vm2, %v740_v62, -inf  ;;  %v741_v3 = vadd.f32 %v737_v60, %v2507_v56 }
 0x3fd   : > { %749 = vmax.xlane.f32.xlu1 %v748_v2  ;;  %v680_v4 = vpop.f32.mrb[6].mxu1 }
 0x3fe   : > { %v735_v5 = vmul.f32 0.25, %v680_v4  ;;  %v2109_v6 = vpop.f32.mrb[7].mxu1  ;;  %v751_v7 = vsel %vm636_vm2, %v741_v3, -inf  ;;  %v738_v8 = vadd.f32 %v734_v0, %v2507_v56 }
 0x3ff   : > { %752 = vmax.xlane.f32.xlu0 %v751_v7 }
 0x400   : > { %v742_v9 = vsel %vm636_vm2, %v738_v8, -inf  ;;  %v739_v10 = vadd.f32 %v735_v5, %v2507_v56  ;;  %v1978_v5 = vld [vmem:[%s2759_s7] ss:$0 sm:$0xff] }
 0x402   : > { %v745_v11 = vsel %vm636_vm2, %v739_v10, -inf }
 0x403   : > { %743 = vmax.xlane.f32.xlu0 %v742_v9 }
 0x407   : > { %746 = vmax.xlane.f32.xlu0 %v745_v11 }
 0x48a   : > { %v750_v12 = vpop.xlane.xlu1 %749 }
 0x48b   : > { %v756_v13 = vsub.f32 %v740_v62, %v750_v12 }
 0x48c   : > { %v753_v14 = vpop.xlane.xlu0 %752 }
 0x48d   : > { %v762_v16 = vmul.f32 1.442695, %v756_v13  ;;  %v757_v17 = vsub.f32 %v741_v3, %v753_v14 }
 0x48f   : > { %2275 = vpow2.f32 %v762_v16  ;;  %v764_v18 = vmul.f32 1.442695, %v757_v17 }
 0x490   : > { %v744_v19 = vpop.xlane.xlu0 %743 }
 0x491   : > { %2277 = vpow2.f32 %v764_v18  ;;  %v754_v20 = vsub.f32 %v738_v8, %v744_v19 }
 0x493   : > { %v758_v21 = vmul.f32 1.442695, %v754_v20 }
 0x494   : > { %v747_v22 = vpop.xlane.xlu0 %746 }
 0x495   : > { %2279 = vpow2.f32 %v758_v21  ;;  %v755_v23 = vsub.f32 %v739_v10, %v747_v22 }
 0x497   : > { %v760_v24 = vmul.f32 1.442695, %v755_v23 }
 0x499   : > { %v2276_v25 = vpop.eup %2275  ;;  %2281 = vpow2.f32 %v760_v24 }
 0x49a   : > { %v772_v26 = vsel %vm636_vm2, %v2276_v25, 0.0 }
 0x49b   : > { %v2278_v27 = vpop.eup %2277  ;;  %773 = vadd.xlane.f32.xlu1 %v772_v26  ;;  %v2256_v26 = vld [vmem:[%s2762_s10 + $0x8] sm:$0xff]  }
 0x49c   : > { %v775_v28 = vsel %vm636_vm2, %v2278_v27, 0.0 }
 0x49d   : > { %776 = vadd.xlane.f32.xlu0 %v775_v28 }
 0x49f   : > { %v2280_v29 = vpop.eup %2279 }
 0x4a0   : > { %v766_v30 = vsel %vm636_vm2, %v2280_v29, 0.0 }
 0x4a1   : > { %767 = vadd.xlane.f32.xlu0 %v766_v30 }
 0x4a3   : > { %v2282_v33 = vpop.eup %2281 }
 0x4a4   : > { %v769_v34 = vsel %vm636_vm2, %v2282_v33, 0.0 }
 0x4a5   : > { %770 = vadd.xlane.f32.xlu0 %v769_v34 }
 0x4ac   : > { %835 = vrot.lane.b32.xlu1 %v2489_v46, %s2344_s17 }
 0x4bb   : > { %788 = vrot.lane.b32.xlu0 %v2486_v42, %s2344_s17 }
 0x528   : > { %v774_v35 = vpop.xlane.xlu1 %773 }
 0x529   : > { %2283 = vrcp.f32 %v774_v35 }
 0x52a   : > { %v777_v36 = vpop.xlane.xlu0 %776 }
 0x52b   : > { %2285 = vrcp.f32 %v777_v36 }
 0x52c   : > { %v836_v37 = vpop.permute.xlu1 %835 }
 0x52d   : > { %2123 = vmatpush3.bf16.msra.mxu0 %v836_v37  ;;  %v1982_v37 = vld [vmem:[%s2760_s8] ss:$0 sm:$0xff] }
 0x52e   : > { %v768_v38 = vpop.xlane.xlu0 %767  ;;  %2136 = vmatprep.subr.bf16.mxu0 %v2339_v15 }
 0x52f   : > { %2287 = vrcp.f32 %v768_v38 }
 0x532   : > { %v771_v39 = vpop.xlane.xlu0 %770 }
 0x533   : > { %v2284_v40 = vpop.eup %2283  ;;  %2289 = vrcp.f32 %v771_v39 }
 0x534   : > { %v784_v43 = vmul.f32 %v2284_v40, %v2276_v25 }
 0x535   : > { %v2286_v41 = vpop.eup %2285 }
 0x536   : > { %v785_v44 = vmul.f32 %v2286_v41, %v2278_v27  ;;  %v789_v45 = vpop.permute.xlu0 %788  ;;  %v1983_v41 = vld [vmem:[%s2761_s9] ss:$0 sm:$0xff] }
 0x537   : > { %2117 = vmatpush3.bf16.msra.mxu1 %v789_v45 }
 0x538   : > { %v787_v46 = vpack.c.bf16 %v785_v44, %v784_v43  ;;  %2128 = vmatprep.subr.bf16.mxu1 %v2339_v15 }
 0x539   : > { %v2288_v42 = vpop.eup %2287 }
 0x53a   : > { %2125 = vmatmul.mubr.msk.bf16.vlgmr.msra.gmra.mrb[4].mxu0 %vm636_vm2, %v787_v46  ;;  %v782_v48 = vmul.f32 %v2288_v42, %v2280_v29  ;;  %v2257_v42 = vld [vmem:[%s2764_s12] sm:$0xff]  }
 0x53b   : > { %2140 = vmatprep.mubr.msk.bf16.mxu0 %vm2340_vm1, %v2339_v15 }
 0x53d   : > { %v2290_v47 = vpop.eup %2289 }
 0x53e   : > { %v783_v49 = vmul.f32 %v2290_v47, %v2282_v33  ;;  %v2258_v47 = vld [vmem:[%s2764_s12 + $0x8] sm:$0xff]  }
 0x540   : > { %v786_v50 = vpack.c.bf16 %v783_v49, %v782_v48  ;;  %v2259_v48 = vld [vmem:[%s2764_s12 + $0x10] sm:$0xff]   ;;  %v2260_v49 = vld [vmem:[%s2764_s12 + $0x18] sm:$0xff]  }
 0x542   : > { %2119 = vmatmul.mubr.msk.bf16.vlgmr.msra.gmra.mrb[8].mxu1 %vm636_vm2, %v786_v50  ;;  %v1984_v50 = vld [vmem:[%s2763_s11] ss:$0 sm:$0xff] }
 0x543   : > { %2132 = vmatprep.mubr.msk.bf16.mxu1 %vm2340_vm1, %v2339_v15  ;;  %2129 = vmatpush3.bf16.msra.mxu1 %v2253_v51 }
 0x544   : > { %2130 = vmatprep.subr.bf16.mxu1 %v2339_v15 }
 0x547   : > { %2131 = vmatpush3.bf16.msra.mxu1 %v2254_v52 }
 0x548   : > { %2144 = vmatprep.subr.bf16.mxu1 %v2339_v15 }
 0x60d   : > { %v875_v53 = vpop.f32.mrb[4].mxu0 }
 0x60e   : > { %v2126_v54 = vpop.f32.mrb[5].mxu0 }
 0x60f   : > { %v878_v55 = vpop.f32.mrb[6].mxu0 }
 0x610   : > { %v2236_v57 = vpack.i.bf16 %v878_v55, %v875_v53  ;;  %v2127_v58 = vpop.f32.mrb[7].mxu0 }
 0x612   : > { %2237 = vrot.lane.b32.xlu1 %v2236_v57, %s2345_s22 }
 0x615   : > { %v828_v59 = vpop.f32.mrb[8].mxu1 }
 0x616   : > { %v2120_v60 = vpop.f32.mrb[9].mxu1 }
 0x617   : > { %v831_v61 = vpop.f32.mrb[10].mxu1 }
 0x618   : > { %v2121_v62 = vpop.f32.mrb[11].mxu1 }
 0x684   : > { %v2238_v63 = vpop.permute.xlu1 %2237 }
 0x685   : > { %v2240_v0 = vunpack.i.h.bf16 %v2238_v63  ;;  %v2239_v1 = vunpack.i.l.bf16 %v2238_v63 }
 0x687   : > { %v890_v2 = vsel %vm636_vm2, %v828_v59, %v2239_v1  ;;  %v891_v3 = vsel %vm636_vm2, %v831_v61, %v2240_v0 }
 0x688   : > { %v892_v4 = vpack.c.bf16 %v891_v3, %v890_v2 }
 0x68a   : > { %2133 = vmatmul.mubr.msk.bf16.vlgmr.msra.gmra.mrb[12].mxu1 %vm511_vm0, %v892_v4 }
 0x68b   : > { %2152 = vmatprep.mubr.msk.bf16.mxu1 %vm2340_vm1, %v2339_v15  ;;  %2145 = vmatpush3.bf16.msra.mxu1 %v2257_v42 }
 0x68c   : > { %2146 = vmatprep.subr.bf16.mxu1 %v2339_v15 }
 0x68f   : > { %2147 = vmatpush3.bf16.msra.mxu1 %v2258_v47 }
 0x690   : > { %2148 = vmatprep.subr.bf16.mxu1 %v2339_v15 }
 0x693   : > { %2149 = vmatpush3.bf16.msra.mxu1 %v2259_v48 }
 0x694   : > { %2150 = vmatprep.subr.bf16.mxu1 %v2339_v15 }
 0x697   : > { %2151 = vmatpush3.bf16.msra.mxu1 %v2260_v49  ;;  %v1995_v49 = vld [vmem:[%s2767_s15] ss:$0 sm:$0xff] }
 0x698   : > { %2170 = vmatprep.subr.bf16.mxu1 %v2339_v15 }
 0x75d   : > { %v953_v6 = vpop.f32.mrb[12].mxu1 }
 0x75e   : > { %v954_v7 = vadd.f32 %v1978_v5, %v953_v6  ;;  %v2134_v8 = vpop.f32.mrb[13].mxu1 }
 0x75f   : > { %v956_v9 = vpop.f32.mrb[14].mxu1 }
 0x760   : > { %v957_v10 = vadd.f32 %v1978_v5, %v956_v9  ;;  %v2135_v11 = vpop.f32.mrb[15].mxu1  ;;  %v960_v12 = vadd.f32 %v954_v7, %v2474_v31 }
 0x762   : > { %v964_v13 = vsel %vm511_vm0, %v960_v12, 0.0  ;;  %v961_v14 = vadd.f32 %v957_v10, %v2476_v32  ;;  %v2255_v32 = vld [vmem:[%s2762_s10] sm:$0xff]  }
 0x763   : > { %965 = vadd.xlane.f32.xlu1 %v964_v13  ;;  %2137 = vmatpush3.bf16.msra.mxu0 %v2255_v32  ;;  %v1988_v13 = vld [vmem:[%s2765_s13] ss:$0 sm:$0xff] }
 0x764   : > { %v967_v16 = vsel %vm511_vm0, %v961_v14, 0.0  ;;  %2138 = vmatprep.subr.bf16.mxu0 %v2339_v15 }
 0x765   : > { %968 = vadd.xlane.f32.xlu0 %v967_v16 }
 0x767   : > { %2139 = vmatpush3.bf16.msra.mxu0 %v2256_v26 }
 0x768   : > { %2156 = vmatprep.subr.bf16.mxu0 %v2339_v15 }
 0x7f0   : > { %v966_v17 = vpop.xlane.xlu1 %965 }
 0x7f1   : > { %v970_v18 = vmul.f32 0.03125, %v966_v17 }
 0x7f2   : > { %v969_v19 = vpop.xlane.xlu0 %968 }
 0x7f3   : > { %v972_v20 = vsub.f32 %v960_v12, %v970_v18  ;;  %v971_v21 = vmul.f32 0.03125, %v969_v19 }
 0x7f5   : > { %v973_v22 = vsub.f32 %v961_v14, %v971_v21  ;;  %v974_v23 = vmul.f32 %v972_v20, %v972_v20 }
 0x7f7   : > { %v976_v24 = vsel %vm511_vm0, %v974_v23, 0.0  ;;  %v975_v25 = vmul.f32 %v973_v22, %v973_v22 }
 0x7f8   : > { %977 = vadd.xlane.f32.xlu1 %v976_v24 }
 0x7f9   : > { %v979_v31 = vsel %vm511_vm0, %v975_v25, 0.0 }
 0x7fc   : > { %980 = vadd.xlane.f32.xlu1 %v979_v31 }
 0x885   : > { %v978_v27 = vpop.xlane.xlu1 %977 }
 0x886   : > { %v982_v28 = vmul.f32 0.03125, %v978_v27 }
 0x888   : > { %v984_v29 = vadd.f32 1e-12, %v982_v28 }
 0x889   : > { %v981_v30 = vpop.xlane.xlu1 %980 }
 0x88a   : > { %2291 = vrsqrt.f32 %v984_v29  ;;  %v983_v33 = vmul.f32 0.03125, %v981_v30 }
 0x88c   : > { %v985_v34 = vadd.f32 1e-12, %v983_v33 }
 0x88e   : > { %2293 = vrsqrt.f32 %v985_v34 }
 0x894   : > { %v2292_v35 = vpop.eup %2291 }
 0x895   : > { %v988_v36 = vmul.f32 %v2292_v35, %v972_v20  ;;  %v2261_v35 = vld [vmem:[%s2756_s4 + $0x10] sm:$0xff]  }
 0x897   : > { %v996_v39 = vmul.f32 %v1982_v37, %v988_v36  ;;  %v2262_v36 = vld [vmem:[%s2756_s4 + $0x18] sm:$0xff]  }
 0x898   : > { %v2294_v38 = vpop.eup %2293 }
 0x899   : > { %v989_v40 = vmul.f32 %v2294_v38, %v973_v22  ;;  %v1004_v44 = vadd.f32 %v1983_v41, %v996_v39 }
 0x89b   : > { %v997_v43 = vmul.f32 %v1982_v37, %v989_v40 }
 0x89d   : > { %v1005_v45 = vadd.f32 %v1983_v41, %v997_v43 }
 0x89f   : > { %v1006_v46 = vpack.c.bf16 %v1005_v45, %v1004_v44 }
 0x8a1   : > { %2141 = vmatmul.mubr.msk.bf16.vlgmr.msra.gmra.mrb[8].mxu0 %vm511_vm0, %v1006_v46 }
 0x8a2   : > { %2160 = vmatprep.mubr.msk.bf16.mxu0 %vm2340_vm1, %v2339_v15  ;;  %2157 = vmatpush3.bf16.msra.mxu0 %v2261_v35 }
 0x8a3   : > { %2158 = vmatprep.subr.bf16.mxu0 %v2339_v15 }
 0x8a6   : > { %2159 = vmatpush3.bf16.msra.mxu0 %v2262_v36 }
 0x8a7   : > { %2164 = vmatprep.subr.bf16.mxu0 %v2339_v15 }
 0x974   : > { %v1067_v51 = vpop.f32.mrb[8].mxu0 }
 0x975   : > { %v1068_v52 = vadd.f32 %v1984_v50, %v1067_v51  ;;  %v2142_v53 = vpop.f32.mrb[9].mxu0 }
 0x976   : > { %v1070_v54 = vpop.f32.mrb[10].mxu0 }
 0x977   : > { %v1074_v55 = vmul.f32 %v1068_v52, %v1068_v52  ;;  %v1071_v57 = vadd.f32 %v1984_v50, %v1070_v54  ;;  %v2143_v58 = vpop.f32.mrb[11].mxu0  ;;  %v2001_v54 = vld [vmem:[%s2757_s5 + $0x1] ss:$0 sm:$0xff] }
 0x979   : > { %v1076_v59 = vmul.f32 %v1074_v55, %v1068_v52  ;;  %v1075_v60 = vmul.f32 %v1071_v57, %v1071_v57 }
 0x97b   : > { %v1078_v61 = vmul.f32 0.044715, %v1076_v59  ;;  %v1077_v62 = vmul.f32 %v1075_v60, %v1071_v57 }
 0x97d   : > { %v1080_v63 = vadd.f32 %v1078_v61, %v1068_v52  ;;  %v1079_v0 = vmul.f32 0.044715, %v1077_v62 }
 0x97f   : > { %v1082_v1 = vmul.f32 0.7978846, %v1080_v63  ;;  %v1081_v2 = vadd.f32 %v1079_v0, %v1071_v57 }
 0x981   : > { %2295 = vtanh.f32 %v1082_v1  ;;  %v1083_v3 = vmul.f32 0.7978846, %v1081_v2 }
 0x983   : > { %2297 = vtanh.f32 %v1083_v3 }
 0x98b   : > { %v2296_v4 = vpop.eup %2295 }
 0x98c   : > { %v1086_v5 = vadd.f32 1.0, %v2296_v4 }
 0x98d   : > { %v2298_v6 = vpop.eup %2297 }
 0x98e   : > { %v1088_v7 = vmul.f32 0.5, %v1086_v5  ;;  %v1087_v8 = vadd.f32 1.0, %v2298_v6 }
 0x990   : > { %v1089_v9 = vmul.f32 0.5, %v1087_v8  ;;  %v1090_v10 = vmul.f32 %v1088_v7, %v1068_v52 }
 0x992   : > { %v1091_v11 = vmul.f32 %v1089_v9, %v1071_v57 }
 0x994   : > { %v1092_v12 = vpack.c.bf16 %v1091_v11, %v1090_v10 }
 0x996   : > { %2153 = vmatmul.mubr.msk.bf16.vlgmr.msra.gmra.mrb[16].mxu1 %vm1132_vm4, %v1092_v12 }
 0x997   : > { %2172 = vmatprep.mubr.msk.bf16.mxu1 %vm2340_vm1, %v2339_v15 }
 0xa69   : > { %v1170_v14 = vpop.f32.mrb[16].mxu1 }
 0xa6a   : > { %v1171_v16 = vadd.f32 %v1988_v13, %v1170_v14  ;;  %v2154_v17 = vpop.f32.mrb[17].mxu1 }
 0xa6b   : > { %v1173_v18 = vpop.f32.mrb[18].mxu1 }
 0xa6c   : > { %v1174_v19 = vadd.f32 %v1988_v13, %v1173_v18  ;;  %v2155_v20 = vpop.f32.mrb[19].mxu1  ;;  %v1177_v21 = vadd.f32 %v1171_v16, %v1004_v44 }
 0xa6e   : > { %v1181_v22 = vsel %vm511_vm0, %v1177_v21, 0.0  ;;  %v1178_v23 = vadd.f32 %v1174_v19, %v1005_v45  ;;  %v1994_v45 = vld [vmem:[%s2766_s14] ss:$0 sm:$0xff] }
 0xa6f   : > { %1182 = vadd.xlane.f32.xlu0 %v1181_v22 }
 0xa70   : > { %v1184_v24 = vsel %vm511_vm0, %v1178_v23, 0.0 }
 0xa71   : > { %1185 = vadd.xlane.f32.xlu1 %v1184_v24 }
 0xafc   : > { %v1183_v25 = vpop.xlane.xlu0 %1182 }
 0xafd   : > { %v1187_v31 = vmul.f32 0.03125, %v1183_v25 }
 0xafe   : > { %v1186_v32 = vpop.xlane.xlu1 %1185 }
 0xaff   : > { %v1189_v26 = vsub.f32 %v1177_v21, %v1187_v31  ;;  %v1188_v27 = vmul.f32 0.03125, %v1186_v32 }
 0xb01   : > { %v1190_v28 = vsub.f32 %v1178_v23, %v1188_v27  ;;  %v1191_v29 = vmul.f32 %v1189_v26, %v1189_v26 }
 0xb03   : > { %v1193_v30 = vsel %vm511_vm0, %v1191_v29, 0.0  ;;  %v1192_v33 = vmul.f32 %v1190_v28, %v1190_v28 }
 0xb04   : > { %1194 = vadd.xlane.f32.xlu0 %v1193_v30 }
 0xb05   : > { %v1196_v34 = vsel %vm511_vm0, %v1192_v33, 0.0 }
 0xb06   : > { %1197 = vadd.xlane.f32.xlu1 %v1196_v34 }
 0xb91   : > { %v1195_v37 = vpop.xlane.xlu0 %1194 }
 0xb92   : > { %v1199_v38 = vmul.f32 0.03125, %v1195_v37 }
 0xb93   : > { %v1198_v39 = vpop.xlane.xlu1 %1197 }
 0xb94   : > { %v1201_v40 = vadd.f32 1e-12, %v1199_v38  ;;  %v1200_v41 = vmul.f32 0.03125, %v1198_v39 }
 0xb96   : > { %2299 = vrsqrt.f32 %v1201_v40  ;;  %v1202_v43 = vadd.f32 1e-12, %v1200_v41 }
 0xb98   : > { %2301 = vrsqrt.f32 %v1202_v43 }
 0xba0   : > { %v2300_v44 = vpop.eup %2299 }
 0xba1   : > { %v1205_v46 = vmul.f32 %v2300_v44, %v1189_v26 }
 0xba2   : > { %v2302_v42 = vpop.eup %2301 }
 0xba3   : > { %v1213_v47 = vmul.f32 %v1994_v45, %v1205_v46  ;;  %v1206_v48 = vmul.f32 %v2302_v42, %v1190_v28 }
 0xba5   : > { %v1214_v50 = vmul.f32 %v1994_v45, %v1206_v48  ;;  %v2616_v51 = vadd.f32 %v1995_v49, %v1213_v47 }
 0xba7   : > { %v2618_v52 = vadd.f32 %v1995_v49, %v1214_v50 }
 0xba9   : > { %v1223_v53 = vpack.c.bf16 %v2618_v52, %v2616_v51 }
 0xbab   : > { %2161 = vmatmul.mubr.msk.bf16.vlgmr.msra.gmra.mrb[12].mxu0 %vm511_vm0, %v1223_v53 }
 0xbac   : > { %2166 = vmatprep.mubr.msk.bf16.mxu0 %vm2340_vm1, %v2339_v15 }
 0xc7e   : > { %v1286_v55 = vpop.f32.mrb[12].mxu0 }
 0xc7f   : > { %v2162_v57 = vpop.f32.mrb[13].mxu0  ;;  %v1287_v59 = vadd.f32 %v2001_v54, %v1286_v55 }
 0xc80   : > { %v1289_v58 = vpop.f32.mrb[14].mxu0 }
 0xc81   : > { %v1290_v60 = vadd.f32 %v2001_v54, %v1289_v58  ;;  %v2163_v61 = vpop.f32.mrb[15].mxu0 }
 0xc83   : > { %v2241_v62 = vpack.i.bf16 %v1290_v60, %v1287_v59  ;;  %v2628_v63 = vpack.c.bf16 %v1290_v60, %v1287_v59 }
 0xc85   : > { %2242 = vrot.lane.b32.xlu0 %v2241_v62, %s2341_s29 }
 0xcf7   : > { %v2243_v0 = vpop.permute.xlu0 %2242 }
 0xcf8   : > { %v2245_v1 = vunpack.i.h.bf16 %v2243_v0  ;;  %v2244_v2 = vunpack.i.l.bf16 %v2243_v0 }
 0xcfa   : > { %v2631_v3 = vpack.c.bf16 %v2245_v1, %v2244_v2 }
 0xcfc   : > { %1354 = vrot.lane.b32.xlu1 %v2631_v3, %s2342_s30 }
 0xd00   : > { %1304 = vrot.lane.b32.xlu1 %v2628_v63, %s2342_s30 }
 0xd6e   : > { %v1355_v4 = vpop.permute.xlu1 %1354 }
 0xd6f   : > { %v1360_v5 = vsel %vm636_vm2, %v1355_v4, 0  ;;  %v2264_v4 = vld [vmem:[%s2758_s6 + $0x18] sm:$0xff]  }
 0xd70   : > { %2171 = vmatpush3.bf16.xpose.msra.mxu1 %v1360_v5 }
 0xd71   : > { %2182 = vmatprep.subr.bf16.mxu1 %v2339_v15 }
 0xd72   : > { %v1305_v6 = vpop.permute.xlu1 %1304 }
 0xd73   : > { %v1310_v7 = vsel %vm636_vm2, %v1305_v6, 0 }
 0xd74   : > { %2165 = vmatpush3.bf16.xpose.msra.mxu0 %v1310_v7 }
 0xd75   : > { %2176 = vmatprep.subr.bf16.mxu0 %v2339_v15 }
 0xd77   : > { %2173 = vmatmul.mubr.msk.bf16.vlgmr.msra.gmra.mrb[20].mxu1 %vm636_vm2, %v2631_v3 }
 0xd78   : > { %2184 = vmatprep.mubr.msk.bf16.mxu1 %vm2340_vm1, %v2339_v15 }
 0xd7b   : > { %2167 = vmatmul.mubr.msk.bf16.vlgmr.msra.gmra.mrb[16].mxu0 %vm636_vm2, %v2628_v63 }
 0xd7c   : > { %2178 = vmatprep.mubr.msk.bf16.mxu0 %vm2340_vm1, %v2339_v15 }
 0xe4a   : > { %v1396_v8 = vpop.f32.mrb[20].mxu1 }
 0xe4b   : > { %v1405_v9 = vmul.f32 0.25, %v1396_v8  ;;  %v2174_v10 = vpop.f32.mrb[21].mxu1 }
 0xe4c   : > { %v1399_v11 = vpop.f32.mrb[22].mxu1 }
 0xe4d   : > { %v1406_v12 = vmul.f32 0.25, %v1399_v11  ;;  %v2175_v13 = vpop.f32.mrb[23].mxu1  ;;  %v1409_v14 = vadd.f32 %v1405_v9, %v2507_v56 }
 0xe4e   : > { %v1346_v16 = vpop.f32.mrb[16].mxu0 }
 0xe4f   : > { %v1403_v17 = vmul.f32 0.25, %v1346_v16  ;;  %v2168_v18 = vpop.f32.mrb[17].mxu0  ;;  %v1417_v19 = vsel %vm636_vm2, %v1409_v14, -inf  ;;  %v1410_v20 = vadd.f32 %v1406_v12, %v2507_v56 }
 0xe50   : > { %v1349_v21 = vpop.f32.mrb[18].mxu0  ;;  %1418 = vmax.xlane.f32.xlu1 %v1417_v19 }
 0xe51   : > { %v1404_v22 = vmul.f32 0.25, %v1349_v21  ;;  %v2169_v23 = vpop.f32.mrb[19].mxu0  ;;  %v1420_v24 = vsel %vm636_vm2, %v1410_v20, -inf  ;;  %v1407_v25 = vadd.f32 %v1403_v17, %v2507_v56  ;;  %v2014_v21 = vld [vmem:[%s2759_s7 + $0x1] ss:$0 sm:$0xff] }
 0xe52   : > { %1421 = vmax.xlane.f32.xlu0 %v1420_v24 }
 0xe53   : > { %v1411_v31 = vsel %vm636_vm2, %v1407_v25, -inf  ;;  %v1408_v32 = vadd.f32 %v1404_v22, %v2507_v56 }
 0xe55   : > { %v1414_v26 = vsel %vm636_vm2, %v1408_v32, -inf }
 0xe56   : > { %1412 = vmax.xlane.f32.xlu0 %v1411_v31 }
 0xe5a   : > { %1415 = vmax.xlane.f32.xlu0 %v1414_v26 }
 0xedd   : > { %v1419_v27 = vpop.xlane.xlu1 %1418 }
 0xede   : > { %v1425_v28 = vsub.f32 %v1409_v14, %v1419_v27 }
 0xedf   : > { %v1422_v29 = vpop.xlane.xlu0 %1421 }
 0xee0   : > { %v1431_v30 = vmul.f32 1.442695, %v1425_v28  ;;  %v1426_v33 = vsub.f32 %v1410_v20, %v1422_v29 }
 0xee2   : > { %2303 = vpow2.f32 %v1431_v30  ;;  %v1433_v34 = vmul.f32 1.442695, %v1426_v33 }
 0xee3   : > { %v1413_v35 = vpop.xlane.xlu0 %1412 }
 0xee4   : > { %2305 = vpow2.f32 %v1433_v34  ;;  %v1423_v36 = vsub.f32 %v1407_v25, %v1413_v35 }
 0xee6   : > { %v1427_v37 = vmul.f32 1.442695, %v1423_v36 }
 0xee7   : > { %v1416_v38 = vpop.xlane.xlu0 %1415 }
 0xee8   : > { %2307 = vpow2.f32 %v1427_v37  ;;  %v1424_v39 = vsub.f32 %v1408_v32, %v1416_v38 }
 0xeea   : > { %v1429_v40 = vmul.f32 1.442695, %v1424_v39 }
 0xeec   : > { %v2304_v56 = vpop.eup %2303  ;;  %2309 = vpow2.f32 %v1429_v40 }
 0xeed   : > { %v1441_v41 = vsel %vm636_vm2, %v2304_v56, 0.0 }
 0xeee   : > { %v2306_v43 = vpop.eup %2305  ;;  %1442 = vadd.xlane.f32.xlu1 %v1441_v41 }
 0xeef   : > { %v1444_v44 = vsel %vm636_vm2, %v2306_v43, 0.0 }
 0xef0   : > { %1445 = vadd.xlane.f32.xlu0 %v1444_v44 }
 0xef2   : > { %v2308_v45 = vpop.eup %2307 }
 0xef3   : > { %v1435_v46 = vsel %vm636_vm2, %v2308_v45, 0.0 }
 0xef4   : > { %1436 = vadd.xlane.f32.xlu0 %v1435_v46 }
 0xef6   : > { %v2310_v42 = vpop.eup %2309 }
 0xef7   : > { %v1438_v47 = vsel %vm636_vm2, %v2310_v42, 0.0 }
 0xef8   : > { %1439 = vadd.xlane.f32.xlu0 %v1438_v47 }
 0xeff   : > { %1504 = vrot.lane.b32.xlu1 %v2631_v3, %s2344_s17  ;;  %v2263_v3 = vld [vmem:[%s2758_s6 + $0x10] sm:$0xff]  }
 0xf0e   : > { %1457 = vrot.lane.b32.xlu0 %v2628_v63, %s2344_s17 }
 0xf7b   : > { %v1443_v48 = vpop.xlane.xlu1 %1442 }
 0xf7c   : > { %2311 = vrcp.f32 %v1443_v48 }
 0xf7d   : > { %v1446_v49 = vpop.xlane.xlu0 %1445 }
 0xf7e   : > { %2313 = vrcp.f32 %v1446_v49  ;;  %v2020_v49 = vld [vmem:[%s2760_s8 + $0x1] ss:$0 sm:$0xff] }
 0xf7f   : > { %v1505_v50 = vpop.permute.xlu1 %1504 }
 0xf80   : > { %2183 = vmatpush3.bf16.msra.mxu1 %v1505_v50 }
 0xf81   : > { %v1437_v53 = vpop.xlane.xlu0 %1436  ;;  %2196 = vmatprep.subr.bf16.mxu1 %v2339_v15 }
 0xf82   : > { %2315 = vrcp.f32 %v1437_v53 }
 0xf85   : > { %v1440_v54 = vpop.xlane.xlu0 %1439 }
 0xf86   : > { %v2312_v55 = vpop.eup %2311  ;;  %2317 = vrcp.f32 %v1440_v54 }
 0xf87   : > { %v1453_v58 = vmul.f32 %v2312_v55, %v2304_v56  ;;  %v2266_v56 = vld [vmem:[%s2762_s10 + $0x18] sm:$0xff]   ;;  %v2021_v55 = vld [vmem:[%s2761_s9 + $0x1] ss:$0 sm:$0xff] }
 0xf88   : > { %v2314_v57 = vpop.eup %2313 }
 0xf89   : > { %v1454_v59 = vmul.f32 %v2314_v57, %v2306_v43  ;;  %v1458_v60 = vpop.permute.xlu0 %1457 }
 0xf8a   : > { %2177 = vmatpush3.bf16.msra.mxu0 %v1458_v60 }
 0xf8b   : > { %v1456_v61 = vpack.c.bf16 %v1454_v59, %v1453_v58  ;;  %2188 = vmatprep.subr.bf16.mxu0 %v2339_v15 }
 0xf8c   : > { %v2316_v62 = vpop.eup %2315 }
 0xf8d   : > { %2185 = vmatmul.mubr.msk.bf16.vlgmr.msra.gmra.mrb[24].mxu1 %vm636_vm2, %v1456_v61  ;;  %v1451_v0 = vmul.f32 %v2316_v62, %v2308_v45  ;;  %v2267_v61 = vld [vmem:[%s2764_s12 + $0x20] sm:$0xff]   ;;  %v2268_v62 = vld [vmem:[%s2764_s12 + $0x28] sm:$0xff]  }
 0xf8e   : > { %2200 = vmatprep.mubr.msk.bf16.mxu1 %vm2340_vm1, %v2339_v15 }
 0xf90   : > { %v2318_v63 = vpop.eup %2317 }
 0xf91   : > { %v1452_v1 = vmul.f32 %v2318_v63, %v2310_v42  ;;  %v2269_v63 = vld [vmem:[%s2764_s12 + $0x30] sm:$0xff]  }
 0xf93   : > { %v1455_v2 = vpack.c.bf16 %v1452_v1, %v1451_v0  ;;  %v2270_v0 = vld [vmem:[%s2764_s12 + $0x38] sm:$0xff]   ;;  %v2027_v1 = vld [vmem:[%s2763_s11 + $0x1] ss:$0 sm:$0xff] }
 0xf95   : > { %2179 = vmatmul.mubr.msk.bf16.vlgmr.msra.gmra.mrb[20].mxu0 %vm636_vm2, %v1455_v2 }
 0xf96   : > { %2192 = vmatprep.mubr.msk.bf16.mxu0 %vm2340_vm1, %v2339_v15  ;;  %2189 = vmatpush3.bf16.msra.mxu0 %v2263_v3 }
 0xf97   : > { %2190 = vmatprep.subr.bf16.mxu0 %v2339_v15 }
 0xf9a   : > { %2191 = vmatpush3.bf16.msra.mxu0 %v2264_v4 }
 0xf9b   : > { %2204 = vmatprep.subr.bf16.mxu0 %v2339_v15 }
0x1060   : > { %v1544_v5 = vpop.f32.mrb[24].mxu1 }
0x1061   : > { %v2186_v6 = vpop.f32.mrb[25].mxu1 }
0x1062   : > { %v1547_v7 = vpop.f32.mrb[26].mxu1 }
0x1063   : > { %v2246_v8 = vpack.i.bf16 %v1547_v7, %v1544_v5  ;;  %v2187_v9 = vpop.f32.mrb[27].mxu1 }
0x1065   : > { %2247 = vrot.lane.b32.xlu1 %v2246_v8, %s2345_s22 }
0x1068   : > { %v1497_v10 = vpop.f32.mrb[20].mxu0 }
0x1069   : > { %v2180_v11 = vpop.f32.mrb[21].mxu0 }
0x106a   : > { %v1500_v12 = vpop.f32.mrb[22].mxu0 }
0x106b   : > { %v2181_v13 = vpop.f32.mrb[23].mxu0 }
0x10d7   : > { %v2248_v14 = vpop.permute.xlu1 %2247 }
0x10d8   : > { %v2250_v16 = vunpack.i.h.bf16 %v2248_v14  ;;  %v2249_v17 = vunpack.i.l.bf16 %v2248_v14 }
0x10da   : > { %v1560_v18 = vsel %vm636_vm2, %v1500_v12, %v2250_v16  ;;  %v1559_v19 = vsel %vm636_vm2, %v1497_v10, %v2249_v17 }
0x10db   : > { %v1561_v20 = vpack.c.bf16 %v1560_v18, %v1559_v19 }
0x10dd   : > { %2193 = vmatmul.mubr.msk.bf16.vlgmr.msra.gmra.mrb[24].mxu0 %vm511_vm0, %v1561_v20 }
0x10de   : > { %2212 = vmatprep.mubr.msk.bf16.mxu0 %vm2340_vm1, %v2339_v15  ;;  %2205 = vmatpush3.bf16.msra.mxu0 %v2267_v61 }
0x10df   : > { %2206 = vmatprep.subr.bf16.mxu0 %v2339_v15 }
0x10e2   : > { %2207 = vmatpush3.bf16.msra.mxu0 %v2268_v62 }
0x10e3   : > { %2208 = vmatprep.subr.bf16.mxu0 %v2339_v15 }
0x10e6   : > { %2209 = vmatpush3.bf16.msra.mxu0 %v2269_v63 }
0x10e7   : > { %2210 = vmatprep.subr.bf16.mxu0 %v2339_v15 }
0x10ea   : > { %2211 = vmatpush3.bf16.msra.mxu0 %v2270_v0 }
0x11b0   : > { %v1624_v22 = vpop.f32.mrb[24].mxu0 }
0x11b1   : > { %v1625_v23 = vadd.f32 %v2014_v21, %v1624_v22  ;;  %v2194_v24 = vpop.f32.mrb[25].mxu0 }
0x11b2   : > { %v1627_v25 = vpop.f32.mrb[26].mxu0 }
0x11b3   : > { %v1628_v31 = vadd.f32 %v2014_v21, %v1627_v25  ;;  %v2195_v32 = vpop.f32.mrb[27].mxu0  ;;  %v1631_v26 = vadd.f32 %v1625_v23, %v2616_v51 }
0x11b4   : > { %v2040_v32 = vld [vmem:[%s2765_s13 + $0x1] ss:$0 sm:$0xff] }
0x11b5   : > { %v1637_v27 = vsel %vm511_vm0, %v1631_v26, 0.0  ;;  %v1632_v28 = vadd.f32 %v1628_v31, %v2618_v52  ;;  %v2265_v52 = vld [vmem:[%s2762_s10 + $0x10] sm:$0xff]  }
0x11b6   : > { %1638 = vadd.xlane.f32.xlu1 %v1637_v27  ;;  %2197 = vmatpush3.bf16.msra.mxu1 %v2265_v52 }
0x11b7   : > { %v1640_v29 = vsel %vm511_vm0, %v1632_v28, 0.0  ;;  %2198 = vmatprep.subr.bf16.mxu1 %v2339_v15 }
0x11b8   : > { %1641 = vadd.xlane.f32.xlu0 %v1640_v29 }
0x11ba   : > { %2199 = vmatpush3.bf16.msra.mxu1 %v2266_v56 }
0x1243   : > { %v1639_v30 = vpop.xlane.xlu1 %1638 }
0x1244   : > { %v1643_v33 = vmul.f32 0.03125, %v1639_v30 }
0x1245   : > { %v1642_v34 = vpop.xlane.xlu0 %1641 }
0x1246   : > { %v1645_v35 = vsub.f32 %v1631_v26, %v1643_v33  ;;  %v1644_v36 = vmul.f32 0.03125, %v1642_v34 }
0x1248   : > { %v1646_v37 = vsub.f32 %v1632_v28, %v1644_v36  ;;  %v1647_v38 = vmul.f32 %v1645_v35, %v1645_v35 }
0x124a   : > { %v1649_v39 = vsel %vm511_vm0, %v1647_v38, 0.0  ;;  %v1648_v40 = vmul.f32 %v1646_v37, %v1646_v37 }
0x124b   : > { %1650 = vadd.xlane.f32.xlu1 %v1649_v39 }
0x124c   : > { %v1652_v51 = vsel %vm511_vm0, %v1648_v40, 0.0 }
0x124f   : > { %1653 = vadd.xlane.f32.xlu1 %v1652_v51 }
0x12d8   : > { %v1651_v41 = vpop.xlane.xlu1 %1650 }
0x12d9   : > { %v1655_v43 = vmul.f32 0.03125, %v1651_v41 }
0x12db   : > { %v1657_v44 = vadd.f32 1e-12, %v1655_v43 }
0x12dc   : > { %v1654_v45 = vpop.xlane.xlu1 %1653 }
0x12dd   : > { %2319 = vrsqrt.f32 %v1657_v44  ;;  %v1656_v46 = vmul.f32 0.03125, %v1654_v45 }
0x12df   : > { %v1658_v42 = vadd.f32 1e-12, %v1656_v46 }
0x12e1   : > { %2321 = vrsqrt.f32 %v1658_v42 }
0x12e7   : > { %v2320_v47 = vpop.eup %2319 }
0x12e8   : > { %v1661_v48 = vmul.f32 %v2320_v47, %v1645_v35 }
0x12ea   : > { %v1669_v53 = vmul.f32 %v2020_v49, %v1661_v48 }
0x12eb   : > { %v2322_v50 = vpop.eup %2321 }
0x12ec   : > { %v1662_v54 = vmul.f32 %v2322_v50, %v1646_v37  ;;  %v1677_v58 = vadd.f32 %v2021_v55, %v1669_v53 }
0x12ee   : > { %v1670_v57 = vmul.f32 %v2020_v49, %v1662_v54  ;;  %v2048_v54 = vld [vmem:[%s2766_s14 + $0x1] ss:$0 sm:$0xff] }
0x12f0   : > { %v1678_v59 = vadd.f32 %v2021_v55, %v1670_v57 }
0x12f2   : > { %v1679_v60 = vpack.c.bf16 %v1678_v59, %v1677_v58 }
0x12f4   : > { %2201 = vmatmul.mubr.msk.bf16.vlgmr.msra.gmra.mrb[28].mxu1 %vm511_vm0, %v1679_v60 }
0x13c7   : > { %v1742_v2 = vpop.f32.mrb[28].mxu1 }
0x13c8   : > { %v1743_v3 = vadd.f32 %v2027_v1, %v1742_v2  ;;  %v2202_v4 = vpop.f32.mrb[29].mxu1 }
0x13c9   : > { %v1745_v5 = vpop.f32.mrb[30].mxu1 }
0x13ca   : > { %v1749_v6 = vmul.f32 %v1743_v3, %v1743_v3  ;;  %v1746_v7 = vadd.f32 %v2027_v1, %v1745_v5  ;;  %v2203_v8 = vpop.f32.mrb[31].mxu1 }
0x13cc   : > { %v1751_v9 = vmul.f32 %v1749_v6, %v1743_v3  ;;  %v1750_v10 = vmul.f32 %v1746_v7, %v1746_v7 }
0x13ce   : > { %v1753_v11 = vmul.f32 0.044715, %v1751_v9  ;;  %v1752_v15 = vmul.f32 %v1750_v10, %v1746_v7 }
0x13d0   : > { %v1755_v12 = vadd.f32 %v1753_v11, %v1743_v3  ;;  %v1754_v13 = vmul.f32 0.044715, %v1752_v15 }
0x13d2   : > { %v1757_v14 = vmul.f32 0.7978846, %v1755_v12  ;;  %v1756_v16 = vadd.f32 %v1754_v13, %v1746_v7 }
0x13d4   : > { %2323 = vtanh.f32 %v1757_v14  ;;  %v1758_v17 = vmul.f32 0.7978846, %v1756_v16 }
0x13d6   : > { %2325 = vtanh.f32 %v1758_v17 }
0x13de   : > { %v2324_v18 = vpop.eup %2323 }
0x13df   : > { %v1761_v19 = vadd.f32 1.0, %v2324_v18 }
0x13e0   : > { %v2326_v20 = vpop.eup %2325 }
0x13e1   : > { %v1763_v21 = vmul.f32 0.5, %v1761_v19  ;;  %v1762_v22 = vadd.f32 1.0, %v2326_v20 }
0x13e3   : > { %v1764_v23 = vmul.f32 0.5, %v1762_v22  ;;  %v1765_v24 = vmul.f32 %v1763_v21, %v1743_v3 }
0x13e5   : > { %v1766_v25 = vmul.f32 %v1764_v23, %v1746_v7 }
0x13e7   : > { %v1767_v31 = vpack.c.bf16 %v1766_v25, %v1765_v24 }
0x13e9   : > { %2213 = vmatmul.mubr.msk.bf16.vlgmr.msra.gmra.mrb[28].mxu0 %vm1132_vm4, %v1767_v31 }
0x14bc   : > { %v1846_v26 = vpop.f32.mrb[28].mxu0 }
0x14bd   : > { %v1847_v27 = vadd.f32 %v2040_v32, %v1846_v26  ;;  %v2214_v28 = vpop.f32.mrb[29].mxu0 }
0x14be   : > { %v1849_v29 = vpop.f32.mrb[30].mxu0 }
0x14bf   : > { %v1850_v30 = vadd.f32 %v2040_v32, %v1849_v29  ;;  %v2215_v33 = vpop.f32.mrb[31].mxu0  ;;  %v1853_v34 = vadd.f32 %v1847_v27, %v1677_v58  ;;  %v2049_v58 = vld [vmem:[%s2767_s15 + $0x1] ss:$0 sm:$0xff] }
0x14c1   : > { %v1859_v35 = vsel %vm511_vm0, %v1853_v34, 0.0  ;;  %v1854_v36 = vadd.f32 %v1850_v30, %v1678_v59 }
0x14c2   : > { %1860 = vadd.xlane.f32.xlu0 %v1859_v35 }
0x14c3   : > { %v1862_v37 = vsel %vm511_vm0, %v1854_v36, 0.0 }
0x14c4   : > { %1863 = vadd.xlane.f32.xlu1 %v1862_v37 }
0x154f   : > { %v1861_v38 = vpop.xlane.xlu0 %1860 }
0x1550   : > { %v1865_v39 = vmul.f32 0.03125, %v1861_v38 }
0x1551   : > { %v1864_v40 = vpop.xlane.xlu1 %1863 }
0x1552   : > { %v1867_v51 = vsub.f32 %v1853_v34, %v1865_v39  ;;  %v1866_v52 = vmul.f32 0.03125, %v1864_v40 }
0x1554   : > { %v1868_v56 = vsub.f32 %v1854_v36, %v1866_v52  ;;  %v1869_v41 = vmul.f32 %v1867_v51, %v1867_v51 }
0x1556   : > { %v1871_v43 = vsel %vm511_vm0, %v1869_v41, 0.0  ;;  %v1870_v44 = vmul.f32 %v1868_v56, %v1868_v56 }
0x1557   : > { %1872 = vadd.xlane.f32.xlu0 %v1871_v43 }
0x1558   : > { %v1874_v45 = vsel %vm511_vm0, %v1870_v44, 0.0 }
0x1559   : > { %1875 = vadd.xlane.f32.xlu1 %v1874_v45 }
0x15e4   : > { %v1873_v46 = vpop.xlane.xlu0 %1872 }
0x15e5   : > { %v1877_v42 = vmul.f32 0.03125, %v1873_v46 }
0x15e6   : > { %v1876_v47 = vpop.xlane.xlu1 %1875 }
0x15e7   : > { %v1879_v48 = vadd.f32 1e-12, %v1877_v42  ;;  %v1878_v49 = vmul.f32 0.03125, %v1876_v47 }
0x15e9   : > { %2327 = vrsqrt.f32 %v1879_v48  ;;  %v1880_v50 = vadd.f32 1e-12, %v1878_v49 }
0x15eb   : > { %2329 = vrsqrt.f32 %v1880_v50 }
0x15f3   : > { %v2328_v53 = vpop.eup %2327 }
0x15f4   : > { %v1883_v55 = vmul.f32 %v2328_v53, %v1867_v51 }
0x15f5   : > { %v2330_v57 = vpop.eup %2329 }
0x15f6   : > { %v1891_v59 = vmul.f32 %v2048_v54, %v1883_v55  ;;  %v1884_v60 = vmul.f32 %v2330_v57, %v1868_v56 }
0x15f8   : > { %v1899_v61 = vadd.f32 %v2049_v58, %v1891_v59  ;;  %v1892_v62 = vmul.f32 %v2048_v54, %v1884_v60 }
0x15fa   : > { %1901 = vst.msk [vmem:[%s498_s18] sm:$0xff] %vm511_vm0, %v1899_v61  ;;  %v1900_v63 = vadd.f32 %v2049_v58, %v1892_v62 }
0x15fc   : > { %1902 = vst.msk [vmem:[%s498_s18 + $0x8] sm:$0xff] %vm511_vm0, %v1900_v63 }
0x15fd PF: > { %s27_s24 = sadd.s32 1, %s2337_s24  }
0x15fe   : > { %p24_p4 = scmp.ge.s32.totalorder %s27_s24, 4  }
0x1600   :  { %26 = sbr.rel (!%p24_p4) target bundleno = 9 (0x9), region = 122 }

</bundles_post_ra>
